<compile_context>
chip_gen: v5e
topology: v5e:2x2
jax: 0.10.0
libtpu: 0.0.40
codegen_flags: <defaults>
</compile_context>

<pallas_src>
import functools

import jax
import jax.numpy as jnp
from jax import lax
from jax.experimental import pallas as pl
from jax.experimental.pallas import tpu as pltpu


def _round_up(x, m):
    return (x + m - 1) // m * m


def _lif_net_kernel(x_ref, w1t_ref, w2t_ref,
                    rec1_ref, rec2_ref,
                    m1_scr, m2_scr, s1_scr,
                    *, beta1, beta2, threshold, tc, hp, op):
    """One grid step == one (batch-tile, time-chunk).

    Membrane state persists in VMEM scratch across time chunks (inner,
    "arbitrary" grid axis) and is re-zeroed at the start of each batch tile.
    """
    c = pl.program_id(1)  # time-chunk index (innermost grid axis)

    @pl.when(c == 0)
    def _():
        # snn.Leaky.init_leaky() -> zero membrane potential
        m1_scr[...] = jnp.zeros_like(m1_scr)
        m2_scr[...] = jnp.zeros_like(m2_scr)

    b = x_ref.shape[1]
    nin = x_ref.shape[2]
    prec = lax.Precision.HIGHEST  # thresholded model: pin f32 matmul behavior

    # ---- layer-1 synapse for the whole chunk: ONE well-shaped MXU matmul.
    # (Tc, B, Nin) -> (Tc*B, Nin) merges sublane-aligned tiles (B % 8 == 0),
    # so the reshape is layout-compatible (no VMEM copy).
    x_chunk = x_ref[...].reshape(tc * b, nin)
    cur1_chunk = jnp.dot(x_chunk, w1t_ref[...],
                         preferred_element_type=jnp.float32,
                         precision=prec)                        # (Tc*B, Hp)
    rec1_ref[:, :, 0:hp] = cur1_chunk.reshape(tc, b, hp)        # bulk cur1 record

    # ---- layer-1 LIF recurrence: pure VPU, statically unrolled; cur1 kept
    #      in-value (no store->load round trip through the output ref).
    m1 = m1_scr[...]
    for t in range(tc):
        cur1 = cur1_chunk[t * b:(t + 1) * b, :]                 # static slice
        r1 = (m1 - threshold > 0.0).astype(jnp.float32)
        m1 = beta1 * m1 + cur1 - r1 * threshold
        s1 = (m1 - threshold > 0.0).astype(jnp.float32)
        rec1_ref[t, :, hp:2 * hp] = m1                          # mem1 record
        s1_scr[t * b:(t + 1) * b, :] = s1                       # spike slab for fc2
    m1_scr[...] = m1

    # ---- layer-2 synapse hoisted off the recurrence: ONE chunk-level matmul.
    cur2_chunk = jnp.dot(s1_scr[...], w2t_ref[...],
                         preferred_element_type=jnp.float32,
                         precision=prec)                        # (Tc*B, Op)
    rec2_ref[:, :, 0:op] = cur2_chunk.reshape(tc, b, op)        # bulk cur2 record

    # ---- layer-2 LIF recurrence: pure VPU.
    m2 = m2_scr[...]
    for t in range(tc):
        cur2 = cur2_chunk[t * b:(t + 1) * b, :]
        r2 = (m2 - threshold > 0.0).astype(jnp.float32)
        m2 = beta2 * m2 + cur2 - r2 * threshold
        rec2_ref[t, :, op:2 * op] = m2                          # mem2 record
    m2_scr[...] = m2


def net_lif_forward(x, w1, w2, beta, threshold=1.0, *, time_chunk=32):
    """x: (T, B, Nin) f32; w1: (H, Nin); w2: (O, H)   (nn.Linear weight layout)."""
    T, B, Nin = x.shape
    H = w1.shape[0]
    O = w2.shape[0]

    # Lane-dense feature padding.
    Hp = _round_up(H, 128)
    Op = _round_up(O, 128)

    # Batch tiling: sublane-full; aim for >=2 tiles when B >= 16 so the
    # "parallel" grid axis can shard across v7x's two TensorCores.
    Bp = _round_up(B, 8)
    if Bp >= 16:
        Btile = min(_round_up(pl.cdiv(Bp, 2), 8), 128)
    else:
        Btile = Bp
    Bp = _round_up(Bp, Btile)
    nB = Bp // Btile

    # Time chunking without dead padded steps: split T into near-equal chunks.
    nC = max(1, pl.cdiv(T, int(time_chunk)))
    Tc = pl.cdiv(T, nC)
    Tp = Tc * nC

    xp = jnp.zeros((Tp, Bp, Nin), jnp.float32).at[:T, :B, :].set(
        jnp.asarray(x, jnp.float32))
    w1t = jnp.zeros((Nin, Hp), jnp.float32).at[:, :H].set(
        jnp.asarray(w1, jnp.float32).T)                      # (Nin, Hp)
    w2t = jnp.zeros((Hp, Op), jnp.float32).at[:H, :O].set(
        jnp.asarray(w2, jnp.float32).T)                      # (Hp, Op)

    kernel = functools.partial(
        _lif_net_kernel,
        beta1=float(beta[0]), beta2=float(beta[1]), threshold=float(threshold),
        tc=Tc, hp=Hp, op=Op)

    # VMEM budget: double-buffered x/record blocks + resident weights + scratch.
    f32 = 4
    est = (2 * (Tc * Btile * Nin
                + Tc * Btile * 2 * Hp
                + Tc * Btile * 2 * Op)
           + 2 * (Nin * Hp + Hp * Op)
           + (Btile * Hp + Btile * Op + Tc * Btile * Hp)) * f32
    # Raise the 16/32 MiB scoped defaults when needed; cap at v7x's 64 MiB
    # physical VMEM (for very large Hp/Op on v7x, shrink time_chunk/Btile).
    vmem_limit = int(min(max(2 * est, 32 * 1024 * 1024), 64 * 1024 * 1024))

    rec1, rec2 = pl.pallas_call(
        kernel,
        out_shape=(
            jax.ShapeDtypeStruct((Tp, Bp, 2 * Hp), jnp.float32),  # [cur1 | mem1]
            jax.ShapeDtypeStruct((Tp, Bp, 2 * Op), jnp.float32),  # [cur2 | mem2]
        ),
        grid_spec=pltpu.PrefetchScalarGridSpec(
            num_scalar_prefetch=0,
            grid=(nB, nC),                                   # batch tiles x time chunks
            in_specs=[
                pl.BlockSpec((Tc, Btile, Nin), lambda b, c: (c, b, 0)),  # x chunk
                pl.BlockSpec((Nin, Hp), lambda b, c: (0, 0)),            # W1^T resident
                pl.BlockSpec((Hp, Op), lambda b, c: (0, 0)),             # W2^T resident
            ],
            out_specs=[
                pl.BlockSpec((Tc, Btile, 2 * Hp), lambda b, c: (c, b, 0)),
                pl.BlockSpec((Tc, Btile, 2 * Op), lambda b, c: (c, b, 0)),
            ],
            scratch_shapes=[
                pltpu.VMEM((Btile, Hp), jnp.float32),        # mem1 state
                pltpu.VMEM((Btile, Op), jnp.float32),        # mem2 state
                pltpu.VMEM((Tc * Btile, Hp), jnp.float32),   # spk1 chunk slab
            ],
        ),
        compiler_params=pltpu.CompilerParams(
            dimension_semantics=("parallel", "arbitrary"),   # time carries state
            vmem_limit_bytes=vmem_limit),
    )(xp, w1t, w2t)

    thr = float(threshold)
    # Slice padded slabs back and derive spikes (same f32 compare as in-kernel
    # fire(): bit-exact, avoids storing redundant spike records).
    cur1 = rec1[:T, :B, 0:H]
    mem1 = rec1[:T, :B, Hp:Hp + H]
    spk1 = (mem1 - thr > 0.0).astype(jnp.float32)
    cur2 = rec2[:T, :B, 0:O]
    mem2 = rec2[:T, :B, Op:Op + O]
    spk2 = (mem2 - thr > 0.0).astype(jnp.float32)

    return {"cur": [cur1, cur2], "spks": [spk1, spk2], "mem": [mem1, mem2]}


def _reference_forward(x, w1, w2, beta, threshold=1.0):
    """Pure-JAX reference of the same semantics (for validation)."""
    T, B, Nin = x.shape
    H, O = w1.shape[0], w2.shape[0]
    prec = lax.Precision.HIGHEST

    def step(carry, xt):
        m1, m2 = carry
        cur1 = jnp.dot(xt, w1.T, precision=prec)
        r1 = (m1 - threshold > 0.0).astype(jnp.float32)
        m1 = beta[0] * m1 + cur1 - r1 * threshold
        s1 = (m1 - threshold > 0.0).astype(jnp.float32)
        cur2 = jnp.dot(s1, w2.T, precision=prec)
        r2 = (m2 - threshold > 0.0).astype(jnp.float32)
        m2 = beta[1] * m2 + cur2 - r2 * threshold
        s2 = (m2 - threshold > 0.0).astype(jnp.float32)
        return (m1, m2), (cur1, cur2, s1, s2, m1, m2)

    init = (jnp.zeros((B, H), jnp.float32), jnp.zeros((B, O), jnp.float32))
    _, outs = jax.lax.scan(step, init, x)
    return outs


if __name__ == "__main__":
    # Small shapes consistent with the module's forward.
    num_steps, batch = 8, 2
    num_inputs, num_hidden, num_outputs = 16, 32, 10
    beta = (0.9, 0.8)
    weight = (0.5, 0.3)   # synapse weight scales (Weight_synapse.initialize)

    key = jax.random.PRNGKey(0)
    kx, k1, k2 = jax.random.split(key, 3)

    # Deterministic synthetic parameters:
    # fc1: binary {0,1} with P(1)=0.8 (bin_random_prob, probabilities=[0.2, 0.8]),
    #      scaled by weight[0]; fc2: binary with P(1)=0.5, scaled by weight[1].
    w1 = (jax.random.bernoulli(k1, 0.8, (num_hidden, num_inputs))
          .astype(jnp.float32) * weight[0])
    w2 = (jax.random.bernoulli(k2, 0.5, (num_outputs, num_hidden))
          .astype(jnp.float32) * weight[1])

    x = jax.random.normal(kx, (num_steps, batch, num_inputs), jnp.float32)

    out = net_lif_forward(x, w1, w2, beta)
    jax.block_until_ready(out)

    # Validate against pure-JAX reference.
    ref = _reference_forward(x, w1, w2, jnp.asarray(beta, jnp.float32))
    got = (out["cur"][0], out["cur"][1],
           out["spks"][0], out["spks"][1],
           out["mem"][0], out["mem"][1])
    for g, r in zip(got, ref):
        assert g.shape == r.shape
        assert jnp.max(jnp.abs(g - r)) < 1e-5

    print("KERNEL_OK")
</pallas_src>

<mosaic_0001>
module attributes {stable_mosaic.version = 11 : i64} {
  func.func @_lif_net_kernel(%arg0: i32, %arg1: i32, %arg2: memref<8x8x16xf32, #tpu.memory_space<vmem>>, %arg3: memref<16x128xf32, #tpu.memory_space<vmem>>, %arg4: memref<128x128xf32, #tpu.memory_space<vmem>>, %arg5: memref<8x8x256xf32, #tpu.memory_space<vmem>>, %arg6: memref<8x8x256xf32, #tpu.memory_space<vmem>>, %arg7: memref<8x128xf32, #tpu.memory_space<vmem>>, %arg8: memref<8x128xf32, #tpu.memory_space<vmem>>, %arg9: memref<64x128xf32, #tpu.memory_space<vmem>>) attributes {dimension_semantics = [#tpu.dimension_semantics<parallel>, #tpu.dimension_semantics<arbitrary>], iteration_bounds = array<i64: 1, 1>, scalar_prefetch = 0 : i64, scratch_operands = 3 : i64, tpu.core_type = #tpu.core_type<tc>, window_params = [{transform_indices = @transform_0, window_bounds = array<i64: 8, 8, 16>}, {pipeline_mode = #tpu.pipeline_mode<synchronous>, transform_indices = @transform_1, window_bounds = array<i64: 16, 128>}, {pipeline_mode = #tpu.pipeline_mode<synchronous>, transform_indices = @transform_2, window_bounds = array<i64: 128, 128>}, {transform_indices = @transform_3, window_bounds = array<i64: 8, 8, 256>}, {transform_indices = @transform_4, window_bounds = array<i64: 8, 8, 256>}]} {
    %c0_i32 = arith.constant 0 : i32
    %0 = arith.cmpi eq, %arg1, %c0_i32 : i32
    %1 = arith.extui %0 : i1 to i32
    %c0_i32_0 = arith.constant 0 : i32
    %2 = arith.cmpi ne, %1, %c0_i32_0 : i32
    scf.if %2 {
      %cst_153 = arith.constant 0.000000e+00 : f32
      %330 = vector.broadcast %cst_153 : f32 to vector<8x128xf32>
      %c0_154 = arith.constant 0 : index
      %c0_155 = arith.constant 0 : index
      %331 = vector.load %arg7[%c0_154, %c0_155] : memref<8x128xf32, #tpu.memory_space<vmem>>, vector<8x128xf32>
      tpu.vector_store %arg7[%c0_154, %c0_155], %330 {strides = array<i32>} : memref<8x128xf32, #tpu.memory_space<vmem>>, vector<8x128xf32>,
      %cst_156 = arith.constant 0.000000e+00 : f32
      %332 = vector.broadcast %cst_156 : f32 to vector<8x128xf32>
      %c0_157 = arith.constant 0 : index
      %c0_158 = arith.constant 0 : index
      %333 = vector.load %arg8[%c0_157, %c0_158] : memref<8x128xf32, #tpu.memory_space<vmem>>, vector<8x128xf32>
      tpu.vector_store %arg8[%c0_157, %c0_158], %332 {strides = array<i32>} : memref<8x128xf32, #tpu.memory_space<vmem>>, vector<8x128xf32>,
    } else {
    }
    %c0 = arith.constant 0 : index
    %c0_1 = arith.constant 0 : index
    %c0_2 = arith.constant 0 : index
    %3 = vector.load %arg2[%c0, %c0_1, %c0_2] : memref<8x8x16xf32, #tpu.memory_space<vmem>>, vector<8x8x16xf32>
    %4 = vector.shape_cast %3 : vector<8x8x16xf32> to vector<64x16xf32>
    %c0_3 = arith.constant 0 : index
    %c0_4 = arith.constant 0 : index
    %5 = vector.load %arg3[%c0_3, %c0_4] : memref<16x128xf32, #tpu.memory_space<vmem>>, vector<16x128xf32>
    %cst = arith.constant dense<0.000000e+00> : vector<64x128xf32>
    %6 = tpu.matmul %4, %5, %cst {dimension_numbers = #tpu.dot_dimension_numbers<[1], [0], [0], [1], [0, 0, 1, 1], [], []>, precision = #tpu.contract_precision<fp32>} : vector<64x16xf32>, vector<16x128xf32>, vector<64x128xf32> -> vector<64x128xf32>
    %7 = vector.shape_cast %6 : vector<64x128xf32> to vector<8x8x128xf32>
    %c0_5 = arith.constant 0 : index
    %c0_6 = arith.constant 0 : index
    %c0_7 = arith.constant 0 : index
    %8 = vector.load %arg5[%c0_5, %c0_6, %c0_7] : memref<8x8x256xf32, #tpu.memory_space<vmem>>, vector<8x8x128xf32>
    tpu.vector_store %arg5[%c0_5, %c0_6, %c0_7], %7 {strides = array<i32>} : memref<8x8x256xf32, #tpu.memory_space<vmem>>, vector<8x8x128xf32>,
    %c0_8 = arith.constant 0 : index
    %c0_9 = arith.constant 0 : index
    %9 = vector.load %arg7[%c0_8, %c0_9] : memref<8x128xf32, #tpu.memory_space<vmem>>, vector<8x128xf32>
    %10 = vector.extract_strided_slice %6 {offsets = [0, 0], sizes = [8, 128], strides = [1, 1]} : vector<64x128xf32> to vector<8x128xf32>
    %cst_10 = arith.constant 1.000000e+00 : f32
    %11 = vector.broadcast %cst_10 : f32 to vector<8x128xf32>
    %12 = arith.subf %9, %11 : vector<8x128xf32>
    %cst_11 = arith.constant 0.000000e+00 : f32
    %13 = vector.broadcast %cst_11 : f32 to vector<8x128xf32>
    %14 = arith.cmpf ogt, %12, %13 : vector<8x128xf32>
    %15 = arith.extui %14 : vector<8x128xi1> to vector<8x128xi32>
    %16 = arith.sitofp %15 : vector<8x128xi32> to vector<8x128xf32>
    %cst_12 = arith.constant 0.899999976 : f32
    %17 = vector.broadcast %cst_12 : f32 to vector<8x128xf32>
    %18 = arith.mulf %17, %9 : vector<8x128xf32>
    %19 = arith.addf %18, %10 : vector<8x128xf32>
    %cst_13 = arith.constant 1.000000e+00 : f32
    %20 = vector.broadcast %cst_13 : f32 to vector<8x128xf32>
    %21 = arith.mulf %16, %20 : vector<8x128xf32>
    %22 = arith.subf %19, %21 : vector<8x128xf32>
    %cst_14 = arith.constant 1.000000e+00 : f32
    %23 = vector.broadcast %cst_14 : f32 to vector<8x128xf32>
    %24 = arith.subf %22, %23 : vector<8x128xf32>
    %cst_15 = arith.constant 0.000000e+00 : f32
    %25 = vector.broadcast %cst_15 : f32 to vector<8x128xf32>
    %26 = arith.cmpf ogt, %24, %25 : vector<8x128xf32>
    %27 = arith.extui %26 : vector<8x128xi1> to vector<8x128xi32>
    %28 = arith.sitofp %27 : vector<8x128xi32> to vector<8x128xf32>
    %c0_16 = arith.constant 0 : index
    %c0_17 = arith.constant 0 : index
    %c128 = arith.constant 128 : index
    %29 = vector.load %arg5[%c0_16, %c0_17, %c128] : memref<8x8x256xf32, #tpu.memory_space<vmem>>, vector<1x8x128xf32>
    %30 = vector.shape_cast %29 : vector<1x8x128xf32> to vector<8x128xf32>
    %31 = vector.shape_cast %22 : vector<8x128xf32> to vector<1x8x128xf32>
    tpu.vector_store %arg5[%c0_16, %c0_17, %c128], %31 {strides = array<i32>} : memref<8x8x256xf32, #tpu.memory_space<vmem>>, vector<1x8x128xf32>,
    %c0_18 = arith.constant 0 : index
    %c0_19 = arith.constant 0 : index
    %32 = vector.load %arg9[%c0_18, %c0_19] : memref<64x128xf32, #tpu.memory_space<vmem>>, vector<8x128xf32>
    tpu.vector_store %arg9[%c0_18, %c0_19], %28 {strides = array<i32>} : memref<64x128xf32, #tpu.memory_space<vmem>>, vector<8x128xf32>,
    %33 = vector.extract_strided_slice %6 {offsets = [8, 0], sizes = [8, 128], strides = [1, 1]} : vector<64x128xf32> to vector<8x128xf32>
    %cst_20 = arith.constant 1.000000e+00 : f32
    %34 = vector.broadcast %cst_20 : f32 to vector<8x128xf32>
    %35 = arith.subf %22, %34 : vector<8x128xf32>
    %cst_21 = arith.constant 0.000000e+00 : f32
    %36 = vector.broadcast %cst_21 : f32 to vector<8x128xf32>
    %37 = arith.cmpf ogt, %35, %36 : vector<8x128xf32>
    %38 = arith.extui %37 : vector<8x128xi1> to vector<8x128xi32>
    %39 = arith.sitofp %38 : vector<8x128xi32> to vector<8x128xf32>
    %cst_22 = arith.constant 0.899999976 : f32
    %40 = vector.broadcast %cst_22 : f32 to vector<8x128xf32>
    %41 = arith.mulf %40, %22 : vector<8x128xf32>
    %42 = arith.addf %41, %33 : vector<8x128xf32>
    %cst_23 = arith.constant 1.000000e+00 : f32
    %43 = vector.broadcast %cst_23 : f32 to vector<8x128xf32>
    %44 = arith.mulf %39, %43 : vector<8x128xf32>
    %45 = arith.subf %42, %44 : vector<8x128xf32>
    %cst_24 = arith.constant 1.000000e+00 : f32
    %46 = vector.broadcast %cst_24 : f32 to vector<8x128xf32>
    %47 = arith.subf %45, %46 : vector<8x128xf32>
    %cst_25 = arith.constant 0.000000e+00 : f32
    %48 = vector.broadcast %cst_25 : f32 to vector<8x128xf32>
    %49 = arith.cmpf ogt, %47, %48 : vector<8x128xf32>
    %50 = arith.extui %49 : vector<8x128xi1> to vector<8x128xi32>
    %51 = arith.sitofp %50 : vector<8x128xi32> to vector<8x128xf32>
    %c1 = arith.constant 1 : index
    %c0_26 = arith.constant 0 : index
    %c128_27 = arith.constant 128 : index
    %52 = vector.load %arg5[%c1, %c0_26, %c128_27] : memref<8x8x256xf32, #tpu.memory_space<vmem>>, vector<1x8x128xf32>
    %53 = vector.shape_cast %52 : vector<1x8x128xf32> to vector<8x128xf32>
    %54 = vector.shape_cast %45 : vector<8x128xf32> to vector<1x8x128xf32>
    tpu.vector_store %arg5[%c1, %c0_26, %c128_27], %54 {strides = array<i32>} : memref<8x8x256xf32, #tpu.memory_space<vmem>>, vector<1x8x128xf32>,
    %c8 = arith.constant 8 : index
    %c0_28 = arith.constant 0 : index
    %55 = vector.load %arg9[%c8, %c0_28] : memref<64x128xf32, #tpu.memory_space<vmem>>, vector<8x128xf32>
    tpu.vector_store %arg9[%c8, %c0_28], %51 {strides = array<i32>} : memref<64x128xf32, #tpu.memory_space<vmem>>, vector<8x128xf32>,
    %56 = vector.extract_strided_slice %6 {offsets = [16, 0], sizes = [8, 128], strides = [1, 1]} : vector<64x128xf32> to vector<8x128xf32>
    %cst_29 = arith.constant 1.000000e+00 : f32
    %57 = vector.broadcast %cst_29 : f32 to vector<8x128xf32>
    %58 = arith.subf %45, %57 : vector<8x128xf32>
    %cst_30 = arith.constant 0.000000e+00 : f32
    %59 = vector.broadcast %cst_30 : f32 to vector<8x128xf32>
    %60 = arith.cmpf ogt, %58, %59 : vector<8x128xf32>
    %61 = arith.extui %60 : vector<8x128xi1> to vector<8x128xi32>
    %62 = arith.sitofp %61 : vector<8x128xi32> to vector<8x128xf32>
    %cst_31 = arith.constant 0.899999976 : f32
    %63 = vector.broadcast %cst_31 : f32 to vector<8x128xf32>
    %64 = arith.mulf %63, %45 : vector<8x128xf32>
    %65 = arith.addf %64, %56 : vector<8x128xf32>
    %cst_32 = arith.constant 1.000000e+00 : f32
    %66 = vector.broadcast %cst_32 : f32 to vector<8x128xf32>
    %67 = arith.mulf %62, %66 : vector<8x128xf32>
    %68 = arith.subf %65, %67 : vector<8x128xf32>
    %cst_33 = arith.constant 1.000000e+00 : f32
    %69 = vector.broadcast %cst_33 : f32 to vector<8x128xf32>
    %70 = arith.subf %68, %69 : vector<8x128xf32>
    %cst_34 = arith.constant 0.000000e+00 : f32
    %71 = vector.broadcast %cst_34 : f32 to vector<8x128xf32>
    %72 = arith.cmpf ogt, %70, %71 : vector<8x128xf32>
    %73 = arith.extui %72 : vector<8x128xi1> to vector<8x128xi32>
    %74 = arith.sitofp %73 : vector<8x128xi32> to vector<8x128xf32>
    %c2 = arith.constant 2 : index
    %c0_35 = arith.constant 0 : index
    %c128_36 = arith.constant 128 : index
    %75 = vector.load %arg5[%c2, %c0_35, %c128_36] : memref<8x8x256xf32, #tpu.memory_space<vmem>>, vector<1x8x128xf32>
    %76 = vector.shape_cast %75 : vector<1x8x128xf32> to vector<8x128xf32>
    %77 = vector.shape_cast %68 : vector<8x128xf32> to vector<1x8x128xf32>
    tpu.vector_store %arg5[%c2, %c0_35, %c128_36], %77 {strides = array<i32>} : memref<8x8x256xf32, #tpu.memory_space<vmem>>, vector<1x8x128xf32>,
    %c16 = arith.constant 16 : index
    %c0_37 = arith.constant 0 : index
    %78 = vector.load %arg9[%c16, %c0_37] : memref<64x128xf32, #tpu.memory_space<vmem>>, vector<8x128xf32>
    tpu.vector_store %arg9[%c16, %c0_37], %74 {strides = array<i32>} : memref<64x128xf32, #tpu.memory_space<vmem>>, vector<8x128xf32>,
    %79 = vector.extract_strided_slice %6 {offsets = [24, 0], sizes = [8, 128], strides = [1, 1]} : vector<64x128xf32> to vector<8x128xf32>
    %cst_38 = arith.constant 1.000000e+00 : f32
    %80 = vector.broadcast %cst_38 : f32 to vector<8x128xf32>
    %81 = arith.subf %68, %80 : vector<8x128xf32>
    %cst_39 = arith.constant 0.000000e+00 : f32
    %82 = vector.broadcast %cst_39 : f32 to vector<8x128xf32>
    %83 = arith.cmpf ogt, %81, %82 : vector<8x128xf32>
    %84 = arith.extui %83 : vector<8x128xi1> to vector<8x128xi32>
    %85 = arith.sitofp %84 : vector<8x128xi32> to vector<8x128xf32>
    %cst_40 = arith.constant 0.899999976 : f32
    %86 = vector.broadcast %cst_40 : f32 to vector<8x128xf32>
    %87 = arith.mulf %86, %68 : vector<8x128xf32>
    %88 = arith.addf %87, %79 : vector<8x128xf32>
    %cst_41 = arith.constant 1.000000e+00 : f32
    %89 = vector.broadcast %cst_41 : f32 to vector<8x128xf32>
    %90 = arith.mulf %85, %89 : vector<8x128xf32>
    %91 = arith.subf %88, %90 : vector<8x128xf32>
    %cst_42 = arith.constant 1.000000e+00 : f32
    %92 = vector.broadcast %cst_42 : f32 to vector<8x128xf32>
    %93 = arith.subf %91, %92 : vector<8x128xf32>
    %cst_43 = arith.constant 0.000000e+00 : f32
    %94 = vector.broadcast %cst_43 : f32 to vector<8x128xf32>
    %95 = arith.cmpf ogt, %93, %94 : vector<8x128xf32>
    %96 = arith.extui %95 : vector<8x128xi1> to vector<8x128xi32>
    %97 = arith.sitofp %96 : vector<8x128xi32> to vector<8x128xf32>
    %c3 = arith.constant 3 : index
    %c0_44 = arith.constant 0 : index
    %c128_45 = arith.constant 128 : index
    %98 = vector.load %arg5[%c3, %c0_44, %c128_45] : memref<8x8x256xf32, #tpu.memory_space<vmem>>, vector<1x8x128xf32>
    %99 = vector.shape_cast %98 : vector<1x8x128xf32> to vector<8x128xf32>
    %100 = vector.shape_cast %91 : vector<8x128xf32> to vector<1x8x128xf32>
    tpu.vector_store %arg5[%c3, %c0_44, %c128_45], %100 {strides = array<i32>} : memref<8x8x256xf32, #tpu.memory_space<vmem>>, vector<1x8x128xf32>,
    %c24 = arith.constant 24 : index
    %c0_46 = arith.constant 0 : index
    %101 = vector.load %arg9[%c24, %c0_46] : memref<64x128xf32, #tpu.memory_space<vmem>>, vector<8x128xf32>
    tpu.vector_store %arg9[%c24, %c0_46], %97 {strides = array<i32>} : memref<64x128xf32, #tpu.memory_space<vmem>>, vector<8x128xf32>,
    %102 = vector.extract_strided_slice %6 {offsets = [32, 0], sizes = [8, 128], strides = [1, 1]} : vector<64x128xf32> to vector<8x128xf32>
    %cst_47 = arith.constant 1.000000e+00 : f32
    %103 = vector.broadcast %cst_47 : f32 to vector<8x128xf32>
    %104 = arith.subf %91, %103 : vector<8x128xf32>
    %cst_48 = arith.constant 0.000000e+00 : f32
    %105 = vector.broadcast %cst_48 : f32 to vector<8x128xf32>
    %106 = arith.cmpf ogt, %104, %105 : vector<8x128xf32>
    %107 = arith.extui %106 : vector<8x128xi1> to vector<8x128xi32>
    %108 = arith.sitofp %107 : vector<8x128xi32> to vector<8x128xf32>
    %cst_49 = arith.constant 0.899999976 : f32
    %109 = vector.broadcast %cst_49 : f32 to vector<8x128xf32>
    %110 = arith.mulf %109, %91 : vector<8x128xf32>
    %111 = arith.addf %110, %102 : vector<8x128xf32>
    %cst_50 = arith.constant 1.000000e+00 : f32
    %112 = vector.broadcast %cst_50 : f32 to vector<8x128xf32>
    %113 = arith.mulf %108, %112 : vector<8x128xf32>
    %114 = arith.subf %111, %113 : vector<8x128xf32>
    %cst_51 = arith.constant 1.000000e+00 : f32
    %115 = vector.broadcast %cst_51 : f32 to vector<8x128xf32>
    %116 = arith.subf %114, %115 : vector<8x128xf32>
    %cst_52 = arith.constant 0.000000e+00 : f32
    %117 = vector.broadcast %cst_52 : f32 to vector<8x128xf32>
    %118 = arith.cmpf ogt, %116, %117 : vector<8x128xf32>
    %119 = arith.extui %118 : vector<8x128xi1> to vector<8x128xi32>
    %120 = arith.sitofp %119 : vector<8x128xi32> to vector<8x128xf32>
    %c4 = arith.constant 4 : index
    %c0_53 = arith.constant 0 : index
    %c128_54 = arith.constant 128 : index
    %121 = vector.load %arg5[%c4, %c0_53, %c128_54] : memref<8x8x256xf32, #tpu.memory_space<vmem>>, vector<1x8x128xf32>
    %122 = vector.shape_cast %121 : vector<1x8x128xf32> to vector<8x128xf32>
    %123 = vector.shape_cast %114 : vector<8x128xf32> to vector<1x8x128xf32>
    tpu.vector_store %arg5[%c4, %c0_53, %c128_54], %123 {strides = array<i32>} : memref<8x8x256xf32, #tpu.memory_space<vmem>>, vector<1x8x128xf32>,
    %c32 = arith.constant 32 : index
    %c0_55 = arith.constant 0 : index
    %124 = vector.load %arg9[%c32, %c0_55] : memref<64x128xf32, #tpu.memory_space<vmem>>, vector<8x128xf32>
    tpu.vector_store %arg9[%c32, %c0_55], %120 {strides = array<i32>} : memref<64x128xf32, #tpu.memory_space<vmem>>, vector<8x128xf32>,
    %125 = vector.extract_strided_slice %6 {offsets = [40, 0], sizes = [8, 128], strides = [1, 1]} : vector<64x128xf32> to vector<8x128xf32>
    %cst_56 = arith.constant 1.000000e+00 : f32
    %126 = vector.broadcast %cst_56 : f32 to vector<8x128xf32>
    %127 = arith.subf %114, %126 : vector<8x128xf32>
    %cst_57 = arith.constant 0.000000e+00 : f32
    %128 = vector.broadcast %cst_57 : f32 to vector<8x128xf32>
    %129 = arith.cmpf ogt, %127, %128 : vector<8x128xf32>
    %130 = arith.extui %129 : vector<8x128xi1> to vector<8x128xi32>
    %131 = arith.sitofp %130 : vector<8x128xi32> to vector<8x128xf32>
    %cst_58 = arith.constant 0.899999976 : f32
    %132 = vector.broadcast %cst_58 : f32 to vector<8x128xf32>
    %133 = arith.mulf %132, %114 : vector<8x128xf32>
    %134 = arith.addf %133, %125 : vector<8x128xf32>
    %cst_59 = arith.constant 1.000000e+00 : f32
    %135 = vector.broadcast %cst_59 : f32 to vector<8x128xf32>
    %136 = arith.mulf %131, %135 : vector<8x128xf32>
    %137 = arith.subf %134, %136 : vector<8x128xf32>
    %cst_60 = arith.constant 1.000000e+00 : f32
    %138 = vector.broadcast %cst_60 : f32 to vector<8x128xf32>
    %139 = arith.subf %137, %138 : vector<8x128xf32>
    %cst_61 = arith.constant 0.000000e+00 : f32
    %140 = vector.broadcast %cst_61 : f32 to vector<8x128xf32>
    %141 = arith.cmpf ogt, %139, %140 : vector<8x128xf32>
    %142 = arith.extui %141 : vector<8x128xi1> to vector<8x128xi32>
    %143 = arith.sitofp %142 : vector<8x128xi32> to vector<8x128xf32>
    %c5 = arith.constant 5 : index
    %c0_62 = arith.constant 0 : index
    %c128_63 = arith.constant 128 : index
    %144 = vector.load %arg5[%c5, %c0_62, %c128_63] : memref<8x8x256xf32, #tpu.memory_space<vmem>>, vector<1x8x128xf32>
    %145 = vector.shape_cast %144 : vector<1x8x128xf32> to vector<8x128xf32>
    %146 = vector.shape_cast %137 : vector<8x128xf32> to vector<1x8x128xf32>
    tpu.vector_store %arg5[%c5, %c0_62, %c128_63], %146 {strides = array<i32>} : memref<8x8x256xf32, #tpu.memory_space<vmem>>, vector<1x8x128xf32>,
    %c40 = arith.constant 40 : index
    %c0_64 = arith.constant 0 : index
    %147 = vector.load %arg9[%c40, %c0_64] : memref<64x128xf32, #tpu.memory_space<vmem>>, vector<8x128xf32>
    tpu.vector_store %arg9[%c40, %c0_64], %143 {strides = array<i32>} : memref<64x128xf32, #tpu.memory_space<vmem>>, vector<8x128xf32>,
    %148 = vector.extract_strided_slice %6 {offsets = [48, 0], sizes = [8, 128], strides = [1, 1]} : vector<64x128xf32> to vector<8x128xf32>
    %cst_65 = arith.constant 1.000000e+00 : f32
    %149 = vector.broadcast %cst_65 : f32 to vector<8x128xf32>
    %150 = arith.subf %137, %149 : vector<8x128xf32>
    %cst_66 = arith.constant 0.000000e+00 : f32
    %151 = vector.broadcast %cst_66 : f32 to vector<8x128xf32>
    %152 = arith.cmpf ogt, %150, %151 : vector<8x128xf32>
    %153 = arith.extui %152 : vector<8x128xi1> to vector<8x128xi32>
    %154 = arith.sitofp %153 : vector<8x128xi32> to vector<8x128xf32>
    %cst_67 = arith.constant 0.899999976 : f32
    %155 = vector.broadcast %cst_67 : f32 to vector<8x128xf32>
    %156 = arith.mulf %155, %137 : vector<8x128xf32>
    %157 = arith.addf %156, %148 : vector<8x128xf32>
    %cst_68 = arith.constant 1.000000e+00 : f32
    %158 = vector.broadcast %cst_68 : f32 to vector<8x128xf32>
    %159 = arith.mulf %154, %158 : vector<8x128xf32>
    %160 = arith.subf %157, %159 : vector<8x128xf32>
    %cst_69 = arith.constant 1.000000e+00 : f32
    %161 = vector.broadcast %cst_69 : f32 to vector<8x128xf32>
    %162 = arith.subf %160, %161 : vector<8x128xf32>
    %cst_70 = arith.constant 0.000000e+00 : f32
    %163 = vector.broadcast %cst_70 : f32 to vector<8x128xf32>
    %164 = arith.cmpf ogt, %162, %163 : vector<8x128xf32>
    %165 = arith.extui %164 : vector<8x128xi1> to vector<8x128xi32>
    %166 = arith.sitofp %165 : vector<8x128xi32> to vector<8x128xf32>
    %c6 = arith.constant 6 : index
    %c0_71 = arith.constant 0 : index
    %c128_72 = arith.constant 128 : index
    %167 = vector.load %arg5[%c6, %c0_71, %c128_72] : memref<8x8x256xf32, #tpu.memory_space<vmem>>, vector<1x8x128xf32>
    %168 = vector.shape_cast %167 : vector<1x8x128xf32> to vector<8x128xf32>
    %169 = vector.shape_cast %160 : vector<8x128xf32> to vector<1x8x128xf32>
    tpu.vector_store %arg5[%c6, %c0_71, %c128_72], %169 {strides = array<i32>} : memref<8x8x256xf32, #tpu.memory_space<vmem>>, vector<1x8x128xf32>,
    %c48 = arith.constant 48 : index
    %c0_73 = arith.constant 0 : index
    %170 = vector.load %arg9[%c48, %c0_73] : memref<64x128xf32, #tpu.memory_space<vmem>>, vector<8x128xf32>
    tpu.vector_store %arg9[%c48, %c0_73], %166 {strides = array<i32>} : memref<64x128xf32, #tpu.memory_space<vmem>>, vector<8x128xf32>,
    %171 = vector.extract_strided_slice %6 {offsets = [56, 0], sizes = [8, 128], strides = [1, 1]} : vector<64x128xf32> to vector<8x128xf32>
    %cst_74 = arith.constant 1.000000e+00 : f32
    %172 = vector.broadcast %cst_74 : f32 to vector<8x128xf32>
    %173 = arith.subf %160, %172 : vector<8x128xf32>
    %cst_75 = arith.constant 0.000000e+00 : f32
    %174 = vector.broadcast %cst_75 : f32 to vector<8x128xf32>
    %175 = arith.cmpf ogt, %173, %174 : vector<8x128xf32>
    %176 = arith.extui %175 : vector<8x128xi1> to vector<8x128xi32>
    %177 = arith.sitofp %176 : vector<8x128xi32> to vector<8x128xf32>
    %cst_76 = arith.constant 0.899999976 : f32
    %178 = vector.broadcast %cst_76 : f32 to vector<8x128xf32>
    %179 = arith.mulf %178, %160 : vector<8x128xf32>
    %180 = arith.addf %179, %171 : vector<8x128xf32>
    %cst_77 = arith.constant 1.000000e+00 : f32
    %181 = vector.broadcast %cst_77 : f32 to vector<8x128xf32>
    %182 = arith.mulf %177, %181 : vector<8x128xf32>
    %183 = arith.subf %180, %182 : vector<8x128xf32>
    %cst_78 = arith.constant 1.000000e+00 : f32
    %184 = vector.broadcast %cst_78 : f32 to vector<8x128xf32>
    %185 = arith.subf %183, %184 : vector<8x128xf32>
    %cst_79 = arith.constant 0.000000e+00 : f32
    %186 = vector.broadcast %cst_79 : f32 to vector<8x128xf32>
    %187 = arith.cmpf ogt, %185, %186 : vector<8x128xf32>
    %188 = arith.extui %187 : vector<8x128xi1> to vector<8x128xi32>
    %189 = arith.sitofp %188 : vector<8x128xi32> to vector<8x128xf32>
    %c7 = arith.constant 7 : index
    %c0_80 = arith.constant 0 : index
    %c128_81 = arith.constant 128 : index
    %190 = vector.load %arg5[%c7, %c0_80, %c128_81] : memref<8x8x256xf32, #tpu.memory_space<vmem>>, vector<1x8x128xf32>
    %191 = vector.shape_cast %190 : vector<1x8x128xf32> to vector<8x128xf32>
    %192 = vector.shape_cast %183 : vector<8x128xf32> to vector<1x8x128xf32>
    tpu.vector_store %arg5[%c7, %c0_80, %c128_81], %192 {strides = array<i32>} : memref<8x8x256xf32, #tpu.memory_space<vmem>>, vector<1x8x128xf32>,
    %c56 = arith.constant 56 : index
    %c0_82 = arith.constant 0 : index
    %193 = vector.load %arg9[%c56, %c0_82] : memref<64x128xf32, #tpu.memory_space<vmem>>, vector<8x128xf32>
    tpu.vector_store %arg9[%c56, %c0_82], %189 {strides = array<i32>} : memref<64x128xf32, #tpu.memory_space<vmem>>, vector<8x128xf32>,
    %c0_83 = arith.constant 0 : index
    %c0_84 = arith.constant 0 : index
    %194 = vector.load %arg7[%c0_83, %c0_84] : memref<8x128xf32, #tpu.memory_space<vmem>>, vector<8x128xf32>
    tpu.vector_store %arg7[%c0_83, %c0_84], %183 {strides = array<i32>} : memref<8x128xf32, #tpu.memory_space<vmem>>, vector<8x128xf32>,
    %c0_85 = arith.constant 0 : index
    %c0_86 = arith.constant 0 : index
    %195 = vector.load %arg9[%c0_85, %c0_86] : memref<64x128xf32, #tpu.memory_space<vmem>>, vector<64x128xf32>
    %c0_87 = arith.constant 0 : index
    %c0_88 = arith.constant 0 : index
    %196 = vector.load %arg4[%c0_87, %c0_88] : memref<128x128xf32, #tpu.memory_space<vmem>>, vector<128x128xf32>
    %cst_89 = arith.constant dense<0.000000e+00> : vector<64x128xf32>
    %197 = tpu.matmul %195, %196, %cst_89 {dimension_numbers = #tpu.dot_dimension_numbers<[1], [0], [0], [1], [0, 0, 1, 1], [], []>, precision = #tpu.contract_precision<fp32>} : vector<64x128xf32>, vector<128x128xf32>, vector<64x128xf32> -> vector<64x128xf32>
    %198 = vector.shape_cast %197 : vector<64x128xf32> to vector<8x8x128xf32>
    %c0_90 = arith.constant 0 : index
    %c0_91 = arith.constant 0 : index
    %c0_92 = arith.constant 0 : index
    %199 = vector.load %arg6[%c0_90, %c0_91, %c0_92] : memref<8x8x256xf32, #tpu.memory_space<vmem>>, vector<8x8x128xf32>
    tpu.vector_store %arg6[%c0_90, %c0_91, %c0_92], %198 {strides = array<i32>} : memref<8x8x256xf32, #tpu.memory_space<vmem>>, vector<8x8x128xf32>,
    %c0_93 = arith.constant 0 : index
    %c0_94 = arith.constant 0 : index
    %200 = vector.load %arg8[%c0_93, %c0_94] : memref<8x128xf32, #tpu.memory_space<vmem>>, vector<8x128xf32>
    %201 = vector.extract_strided_slice %197 {offsets = [0, 0], sizes = [8, 128], strides = [1, 1]} : vector<64x128xf32> to vector<8x128xf32>
    %cst_95 = arith.constant 1.000000e+00 : f32
    %202 = vector.broadcast %cst_95 : f32 to vector<8x128xf32>
    %203 = arith.subf %200, %202 : vector<8x128xf32>
    %cst_96 = arith.constant 0.000000e+00 : f32
    %204 = vector.broadcast %cst_96 : f32 to vector<8x128xf32>
    %205 = arith.cmpf ogt, %203, %204 : vector<8x128xf32>
    %206 = arith.extui %205 : vector<8x128xi1> to vector<8x128xi32>
    %207 = arith.sitofp %206 : vector<8x128xi32> to vector<8x128xf32>
    %cst_97 = arith.constant 8.000000e-01 : f32
    %208 = vector.broadcast %cst_97 : f32 to vector<8x128xf32>
    %209 = arith.mulf %208, %200 : vector<8x128xf32>
    %210 = arith.addf %209, %201 : vector<8x128xf32>
    %cst_98 = arith.constant 1.000000e+00 : f32
    %211 = vector.broadcast %cst_98 : f32 to vector<8x128xf32>
    %212 = arith.mulf %207, %211 : vector<8x128xf32>
    %213 = arith.subf %210, %212 : vector<8x128xf32>
    %c0_99 = arith.constant 0 : index
    %c0_100 = arith.constant 0 : index
    %c128_101 = arith.constant 128 : index
    %214 = vector.load %arg6[%c0_99, %c0_100, %c128_101] : memref<8x8x256xf32, #tpu.memory_space<vmem>>, vector<1x8x128xf32>
    %215 = vector.shape_cast %214 : vector<1x8x128xf32> to vector<8x128xf32>
    %216 = vector.shape_cast %213 : vector<8x128xf32> to vector<1x8x128xf32>
    tpu.vector_store %arg6[%c0_99, %c0_100, %c128_101], %216 {strides = array<i32>} : memref<8x8x256xf32, #tpu.memory_space<vmem>>, vector<1x8x128xf32>,
    %217 = vector.extract_strided_slice %197 {offsets = [8, 0], sizes = [8, 128], strides = [1, 1]} : vector<64x128xf32> to vector<8x128xf32>
    %cst_102 = arith.constant 1.000000e+00 : f32
    %218 = vector.broadcast %cst_102 : f32 to vector<8x128xf32>
    %219 = arith.subf %213, %218 : vector<8x128xf32>
    %cst_103 = arith.constant 0.000000e+00 : f32
    %220 = vector.broadcast %cst_103 : f32 to vector<8x128xf32>
    %221 = arith.cmpf ogt, %219, %220 : vector<8x128xf32>
    %222 = arith.extui %221 : vector<8x128xi1> to vector<8x128xi32>
    %223 = arith.sitofp %222 : vector<8x128xi32> to vector<8x128xf32>
    %cst_104 = arith.constant 8.000000e-01 : f32
    %224 = vector.broadcast %cst_104 : f32 to vector<8x128xf32>
    %225 = arith.mulf %224, %213 : vector<8x128xf32>
    %226 = arith.addf %225, %217 : vector<8x128xf32>
    %cst_105 = arith.constant 1.000000e+00 : f32
    %227 = vector.broadcast %cst_105 : f32 to vector<8x128xf32>
    %228 = arith.mulf %223, %227 : vector<8x128xf32>
    %229 = arith.subf %226, %228 : vector<8x128xf32>
    %c1_106 = arith.constant 1 : index
    %c0_107 = arith.constant 0 : index
    %c128_108 = arith.constant 128 : index
    %230 = vector.load %arg6[%c1_106, %c0_107, %c128_108] : memref<8x8x256xf32, #tpu.memory_space<vmem>>, vector<1x8x128xf32>
    %231 = vector.shape_cast %230 : vector<1x8x128xf32> to vector<8x128xf32>
    %232 = vector.shape_cast %229 : vector<8x128xf32> to vector<1x8x128xf32>
    tpu.vector_store %arg6[%c1_106, %c0_107, %c128_108], %232 {strides = array<i32>} : memref<8x8x256xf32, #tpu.memory_space<vmem>>, vector<1x8x128xf32>,
    %233 = vector.extract_strided_slice %197 {offsets = [16, 0], sizes = [8, 128], strides = [1, 1]} : vector<64x128xf32> to vector<8x128xf32>
    %cst_109 = arith.constant 1.000000e+00 : f32
    %234 = vector.broadcast %cst_109 : f32 to vector<8x128xf32>
    %235 = arith.subf %229, %234 : vector<8x128xf32>
    %cst_110 = arith.constant 0.000000e+00 : f32
    %236 = vector.broadcast %cst_110 : f32 to vector<8x128xf32>
    %237 = arith.cmpf ogt, %235, %236 : vector<8x128xf32>
    %238 = arith.extui %237 : vector<8x128xi1> to vector<8x128xi32>
    %239 = arith.sitofp %238 : vector<8x128xi32> to vector<8x128xf32>
    %cst_111 = arith.constant 8.000000e-01 : f32
    %240 = vector.broadcast %cst_111 : f32 to vector<8x128xf32>
    %241 = arith.mulf %240, %229 : vector<8x128xf32>
    %242 = arith.addf %241, %233 : vector<8x128xf32>
    %cst_112 = arith.constant 1.000000e+00 : f32
    %243 = vector.broadcast %cst_112 : f32 to vector<8x128xf32>
    %244 = arith.mulf %239, %243 : vector<8x128xf32>
    %245 = arith.subf %242, %244 : vector<8x128xf32>
    %c2_113 = arith.constant 2 : index
    %c0_114 = arith.constant 0 : index
    %c128_115 = arith.constant 128 : index
    %246 = vector.load %arg6[%c2_113, %c0_114, %c128_115] : memref<8x8x256xf32, #tpu.memory_space<vmem>>, vector<1x8x128xf32>
    %247 = vector.shape_cast %246 : vector<1x8x128xf32> to vector<8x128xf32>
    %248 = vector.shape_cast %245 : vector<8x128xf32> to vector<1x8x128xf32>
    tpu.vector_store %arg6[%c2_113, %c0_114, %c128_115], %248 {strides = array<i32>} : memref<8x8x256xf32, #tpu.memory_space<vmem>>, vector<1x8x128xf32>,
    %249 = vector.extract_strided_slice %197 {offsets = [24, 0], sizes = [8, 128], strides = [1, 1]} : vector<64x128xf32> to vector<8x128xf32>
    %cst_116 = arith.constant 1.000000e+00 : f32
    %250 = vector.broadcast %cst_116 : f32 to vector<8x128xf32>
    %251 = arith.subf %245, %250 : vector<8x128xf32>
    %cst_117 = arith.constant 0.000000e+00 : f32
    %252 = vector.broadcast %cst_117 : f32 to vector<8x128xf32>
    %253 = arith.cmpf ogt, %251, %252 : vector<8x128xf32>
    %254 = arith.extui %253 : vector<8x128xi1> to vector<8x128xi32>
    %255 = arith.sitofp %254 : vector<8x128xi32> to vector<8x128xf32>
    %cst_118 = arith.constant 8.000000e-01 : f32
    %256 = vector.broadcast %cst_118 : f32 to vector<8x128xf32>
    %257 = arith.mulf %256, %245 : vector<8x128xf32>
    %258 = arith.addf %257, %249 : vector<8x128xf32>
    %cst_119 = arith.constant 1.000000e+00 : f32
    %259 = vector.broadcast %cst_119 : f32 to vector<8x128xf32>
    %260 = arith.mulf %255, %259 : vector<8x128xf32>
    %261 = arith.subf %258, %260 : vector<8x128xf32>
    %c3_120 = arith.constant 3 : index
    %c0_121 = arith.constant 0 : index
    %c128_122 = arith.constant 128 : index
    %262 = vector.load %arg6[%c3_120, %c0_121, %c128_122] : memref<8x8x256xf32, #tpu.memory_space<vmem>>, vector<1x8x128xf32>
    %263 = vector.shape_cast %262 : vector<1x8x128xf32> to vector<8x128xf32>
    %264 = vector.shape_cast %261 : vector<8x128xf32> to vector<1x8x128xf32>
    tpu.vector_store %arg6[%c3_120, %c0_121, %c128_122], %264 {strides = array<i32>} : memref<8x8x256xf32, #tpu.memory_space<vmem>>, vector<1x8x128xf32>,
    %265 = vector.extract_strided_slice %197 {offsets = [32, 0], sizes = [8, 128], strides = [1, 1]} : vector<64x128xf32> to vector<8x128xf32>
    %cst_123 = arith.constant 1.000000e+00 : f32
    %266 = vector.broadcast %cst_123 : f32 to vector<8x128xf32>
    %267 = arith.subf %261, %266 : vector<8x128xf32>
    %cst_124 = arith.constant 0.000000e+00 : f32
    %268 = vector.broadcast %cst_124 : f32 to vector<8x128xf32>
    %269 = arith.cmpf ogt, %267, %268 : vector<8x128xf32>
    %270 = arith.extui %269 : vector<8x128xi1> to vector<8x128xi32>
    %271 = arith.sitofp %270 : vector<8x128xi32> to vector<8x128xf32>
    %cst_125 = arith.constant 8.000000e-01 : f32
    %272 = vector.broadcast %cst_125 : f32 to vector<8x128xf32>
    %273 = arith.mulf %272, %261 : vector<8x128xf32>
    %274 = arith.addf %273, %265 : vector<8x128xf32>
    %cst_126 = arith.constant 1.000000e+00 : f32
    %275 = vector.broadcast %cst_126 : f32 to vector<8x128xf32>
    %276 = arith.mulf %271, %275 : vector<8x128xf32>
    %277 = arith.subf %274, %276 : vector<8x128xf32>
    %c4_127 = arith.constant 4 : index
    %c0_128 = arith.constant 0 : index
    %c128_129 = arith.constant 128 : index
    %278 = vector.load %arg6[%c4_127, %c0_128, %c128_129] : memref<8x8x256xf32, #tpu.memory_space<vmem>>, vector<1x8x128xf32>
    %279 = vector.shape_cast %278 : vector<1x8x128xf32> to vector<8x128xf32>
    %280 = vector.shape_cast %277 : vector<8x128xf32> to vector<1x8x128xf32>
    tpu.vector_store %arg6[%c4_127, %c0_128, %c128_129], %280 {strides = array<i32>} : memref<8x8x256xf32, #tpu.memory_space<vmem>>, vector<1x8x128xf32>,
    %281 = vector.extract_strided_slice %197 {offsets = [40, 0], sizes = [8, 128], strides = [1, 1]} : vector<64x128xf32> to vector<8x128xf32>
    %cst_130 = arith.constant 1.000000e+00 : f32
    %282 = vector.broadcast %cst_130 : f32 to vector<8x128xf32>
    %283 = arith.subf %277, %282 : vector<8x128xf32>
    %cst_131 = arith.constant 0.000000e+00 : f32
    %284 = vector.broadcast %cst_131 : f32 to vector<8x128xf32>
    %285 = arith.cmpf ogt, %283, %284 : vector<8x128xf32>
    %286 = arith.extui %285 : vector<8x128xi1> to vector<8x128xi32>
    %287 = arith.sitofp %286 : vector<8x128xi32> to vector<8x128xf32>
    %cst_132 = arith.constant 8.000000e-01 : f32
    %288 = vector.broadcast %cst_132 : f32 to vector<8x128xf32>
    %289 = arith.mulf %288, %277 : vector<8x128xf32>
    %290 = arith.addf %289, %281 : vector<8x128xf32>
    %cst_133 = arith.constant 1.000000e+00 : f32
    %291 = vector.broadcast %cst_133 : f32 to vector<8x128xf32>
    %292 = arith.mulf %287, %291 : vector<8x128xf32>
    %293 = arith.subf %290, %292 : vector<8x128xf32>
    %c5_134 = arith.constant 5 : index
    %c0_135 = arith.constant 0 : index
    %c128_136 = arith.constant 128 : index
    %294 = vector.load %arg6[%c5_134, %c0_135, %c128_136] : memref<8x8x256xf32, #tpu.memory_space<vmem>>, vector<1x8x128xf32>
    %295 = vector.shape_cast %294 : vector<1x8x128xf32> to vector<8x128xf32>
    %296 = vector.shape_cast %293 : vector<8x128xf32> to vector<1x8x128xf32>
    tpu.vector_store %arg6[%c5_134, %c0_135, %c128_136], %296 {strides = array<i32>} : memref<8x8x256xf32, #tpu.memory_space<vmem>>, vector<1x8x128xf32>,
    %297 = vector.extract_strided_slice %197 {offsets = [48, 0], sizes = [8, 128], strides = [1, 1]} : vector<64x128xf32> to vector<8x128xf32>
    %cst_137 = arith.constant 1.000000e+00 : f32
    %298 = vector.broadcast %cst_137 : f32 to vector<8x128xf32>
    %299 = arith.subf %293, %298 : vector<8x128xf32>
    %cst_138 = arith.constant 0.000000e+00 : f32
    %300 = vector.broadcast %cst_138 : f32 to vector<8x128xf32>
    %301 = arith.cmpf ogt, %299, %300 : vector<8x128xf32>
    %302 = arith.extui %301 : vector<8x128xi1> to vector<8x128xi32>
    %303 = arith.sitofp %302 : vector<8x128xi32> to vector<8x128xf32>
    %cst_139 = arith.constant 8.000000e-01 : f32
    %304 = vector.broadcast %cst_139 : f32 to vector<8x128xf32>
    %305 = arith.mulf %304, %293 : vector<8x128xf32>
    %306 = arith.addf %305, %297 : vector<8x128xf32>
    %cst_140 = arith.constant 1.000000e+00 : f32
    %307 = vector.broadcast %cst_140 : f32 to vector<8x128xf32>
    %308 = arith.mulf %303, %307 : vector<8x128xf32>
    %309 = arith.subf %306, %308 : vector<8x128xf32>
    %c6_141 = arith.constant 6 : index
    %c0_142 = arith.constant 0 : index
    %c128_143 = arith.constant 128 : index
    %310 = vector.load %arg6[%c6_141, %c0_142, %c128_143] : memref<8x8x256xf32, #tpu.memory_space<vmem>>, vector<1x8x128xf32>
    %311 = vector.shape_cast %310 : vector<1x8x128xf32> to vector<8x128xf32>
    %312 = vector.shape_cast %309 : vector<8x128xf32> to vector<1x8x128xf32>
    tpu.vector_store %arg6[%c6_141, %c0_142, %c128_143], %312 {strides = array<i32>} : memref<8x8x256xf32, #tpu.memory_space<vmem>>, vector<1x8x128xf32>,
    %313 = vector.extract_strided_slice %197 {offsets = [56, 0], sizes = [8, 128], strides = [1, 1]} : vector<64x128xf32> to vector<8x128xf32>
    %cst_144 = arith.constant 1.000000e+00 : f32
    %314 = vector.broadcast %cst_144 : f32 to vector<8x128xf32>
    %315 = arith.subf %309, %314 : vector<8x128xf32>
    %cst_145 = arith.constant 0.000000e+00 : f32
    %316 = vector.broadcast %cst_145 : f32 to vector<8x128xf32>
    %317 = arith.cmpf ogt, %315, %316 : vector<8x128xf32>
    %318 = arith.extui %317 : vector<8x128xi1> to vector<8x128xi32>
    %319 = arith.sitofp %318 : vector<8x128xi32> to vector<8x128xf32>
    %cst_146 = arith.constant 8.000000e-01 : f32
    %320 = vector.broadcast %cst_146 : f32 to vector<8x128xf32>
    %321 = arith.mulf %320, %309 : vector<8x128xf32>
    %322 = arith.addf %321, %313 : vector<8x128xf32>
    %cst_147 = arith.constant 1.000000e+00 : f32
    %323 = vector.broadcast %cst_147 : f32 to vector<8x128xf32>
    %324 = arith.mulf %319, %323 : vector<8x128xf32>
    %325 = arith.subf %322, %324 : vector<8x128xf32>
    %c7_148 = arith.constant 7 : index
    %c0_149 = arith.constant 0 : index
    %c128_150 = arith.constant 128 : index
    %326 = vector.load %arg6[%c7_148, %c0_149, %c128_150] : memref<8x8x256xf32, #tpu.memory_space<vmem>>, vector<1x8x128xf32>
    %327 = vector.shape_cast %326 : vector<1x8x128xf32> to vector<8x128xf32>
    %328 = vector.shape_cast %325 : vector<8x128xf32> to vector<1x8x128xf32>
    tpu.vector_store %arg6[%c7_148, %c0_149, %c128_150], %328 {strides = array<i32>} : memref<8x8x256xf32, #tpu.memory_space<vmem>>, vector<1x8x128xf32>,
    %c0_151 = arith.constant 0 : index
    %c0_152 = arith.constant 0 : index
    %329 = vector.load %arg8[%c0_151, %c0_152] : memref<8x128xf32, #tpu.memory_space<vmem>>, vector<8x128xf32>
    tpu.vector_store %arg8[%c0_151, %c0_152], %325 {strides = array<i32>} : memref<8x128xf32, #tpu.memory_space<vmem>>, vector<8x128xf32>,
    return
  }
  func.func @transform_0(%arg0: i32, %arg1: i32) -> (i32, i32, i32) {
    %c0_i32 = arith.constant 0 : i32
    %c0_i32_0 = arith.constant 0 : i32
    return %arg1, %arg0, %c0_i32 : i32, i32, i32
  }
  func.func @transform_1(%arg0: i32, %arg1: i32) -> (i32, i32) {
    %c0_i32 = arith.constant 0 : i32
    %c0_i32_0 = arith.constant 0 : i32
    %c0_i32_1 = arith.constant 0 : i32
    return %c0_i32, %c0_i32_0 : i32, i32
  }
  func.func @transform_2(%arg0: i32, %arg1: i32) -> (i32, i32) {
    %c0_i32 = arith.constant 0 : i32
    %c0_i32_0 = arith.constant 0 : i32
    %c0_i32_1 = arith.constant 0 : i32
    return %c0_i32, %c0_i32_0 : i32, i32
  }
  func.func @transform_3(%arg0: i32, %arg1: i32) -> (i32, i32, i32) {
    %c0_i32 = arith.constant 0 : i32
    %c0_i32_0 = arith.constant 0 : i32
    return %arg1, %arg0, %c0_i32 : i32, i32, i32
  }
  func.func @transform_4(%arg0: i32, %arg1: i32) -> (i32, i32, i32) {
    %c0_i32 = arith.constant 0 : i32
    %c0_i32_0 = arith.constant 0 : i32
    return %arg1, %arg0, %c0_i32 : i32, i32, i32
  }
}

</mosaic_0001>

<bundles_post_ra>
// kernel: tpu_custom_call.1
= control target key start
LH: loop header
LB: loop body
LE: loop exit
PB: predicated region body
PF: predicated region fallthrough
CT: control target
= control target key end

     0   :  { %10 = vsyncpa [#allocation6], 0  ;;  %s1968_s0 = inlined_call_operand.hbm [shape: f32[8,8,16], index: 0, kind: input, shape index: {}]   ;;  %s1969_s1 = inlined_call_operand.hbm [shape: f32[16,128], index: 1, kind: input, shape index: {}]   ;;  %s1970_s2 = inlined_call_operand.hbm [shape: f32[128,128], index: 2, kind: input, shape index: {}]   ;;  %s1971_s3 = inlined_call_operand.hbm [shape: f32[8,8,256], index: 3, kind: output, shape index: {0}]   ;;  %s1972_s4 = inlined_call_operand.hbm [shape: f32[8,8,256], index: 4, kind: output, shape index: {1}]  }
   0x1   :  { %11 = vsyncpa [#allocation9], 0 }
   0x2   :  { %12 = vsyncpa [#allocation7], 0 }
   0x3   :  { %13 = vsyncpa [#allocation13], 0  ;;  %s31_s17 = sshll.u32 %s1969_s1, 4  ;;  %s1473_s18 = smov [#allocation8]   ;;  %s32_s17 = int_to_ptr.hbm [resolvable:$true] %s31_s17 }
   0x4   :  { %s33_s19 = sshll.u32 %s1473_s18, 4  ;;  %s18_s22 = sshll.u32 %s1968_s0, 4  ;;  %s34_s19 = int_to_ptr.vmem [resolvable:$true] %s33_s19  ;;  %s19_s22 = int_to_ptr.hbm [resolvable:$true] %s18_s22 }
   0x5   :  { %s1474_s23 = smov 128   ;;  %s1475_s24 = smov 8  }
   0x6   :  { %39 = dma.hbm_to_vmem [thread:$0]  %s32_s17, 256, %s34_s19, [#allocation9], %s1474_s23, %s1474_s23, %s1475_s24  }
   0x7   :  { %s1476_s25 = smov [#allocation5]   ;;  %s44_s29 = sshll.u32 %s1970_s2, 4  ;;  %s45_s29 = int_to_ptr.hbm [resolvable:$true] %s44_s29 }
   0x8   :  { %s20_s26 = sshll.u32 %s1476_s25, 4  ;;  %s1477_s1 = smov [#allocation10]   ;;  %s21_s26 = int_to_ptr.vmem [resolvable:$true] %s20_s26 }
   0x9   :  { %26 = dma.hbm_to_vmem [thread:$0]  %s19_s22, 1024, %s21_s26, [#allocation6], %s1474_s23, %s1474_s23, %s1475_s24  }
   0xa   :  { %s46_s30 = sshll.u32 %s1477_s1, 4  ;;  %s47_s30 = int_to_ptr.vmem [resolvable:$true] %s46_s30 }
   0xb   :  { %52 = dma.hbm_to_vmem [thread:$0]  %s45_s29, 2048, %s47_s30, [#allocation9], %s1474_s23, %s1474_s23, %s1475_s24  }
   0xc   :  { %1465 = dma.done.wait [#allocation6], 1024  }
   0xd   :  { %1466 = vsyncadd [#allocation6], 4294966272 }
   0xe   :  { %1467 = dma.done.wait [#allocation9], 2304  }
   0xf   :  { %1468 = vsyncadd [#allocation9], 4294964992  ;;  %vm81_vm0 = vcmask 130048   ;;  %v80_v0 = vld [vmem:[#allocation8 + $0x8] sm:$0xff]  ;;  %v79_v1 = vld [vmem:[#allocation8] sm:$0xff]  ;;  %s1480_s0 = smov [#allocation11]  }
  0x10   :  { %v71_v2 = vld [vmem:[#allocation5] sm:$0xff]  ;;  %v120_v3 = vand.u32 4294901760, %v80_v0  ;;  %v122_v4 = vand.u32 4294901760, %v79_v1  ;;  %v72_v6 = vld [vmem:[#allocation5 + $0x8] sm:$0xff]  ;;  %v73_v9 = vld [vmem:[#allocation5 + $0x10] sm:$0xff]  ;;  %s1242_s2 = sshll.u32 %s1480_s0, 4  ;;  %s1243_s2 = int_to_ptr.vmem [resolvable:$true] %s1242_s2 }
  0x11   :  { %v83_v5 = vsel %vm81_vm0, %v71_v2, 0  ;;  %v86_v8 = vsel %vm81_vm0, %v72_v6, 0  ;;  %v89_v17 = vsel %vm81_vm0, %v73_v9, 0  ;;  %v74_v27 = vld [vmem:[#allocation5 + $0x18] sm:$0xff]  ;;  %v75_v34 = vld [vmem:[#allocation5 + $0x20] sm:$0xff]  ;;  %v76_v41 = vld [vmem:[#allocation5 + $0x28] sm:$0xff] }
  0x12   :  { %v1519_v7 = vand.u32 4294901760, %v83_v5  ;;  %v204_v10 = vsub.f32 %v80_v0, %v120_v3  ;;  %121 = vmatpush.msra.mxu0 %v120_v3  ;;  %v210_v11 = vsub.f32 %v79_v1, %v122_v4  ;;  %324 = vmatpush.msra.mxu3 %v120_v3  ;;  %v1522_v12 = vand.u32 4294901760, %v86_v8  ;;  %v77_v48 = vld [vmem:[#allocation5 + $0x30] sm:$0xff]  ;;  %v78_v55 = vld [vmem:[#allocation5 + $0x38] sm:$0xff]  ;;  %s1244_s7 = sshll.u32 %s1971_s3, 4  ;;  %s1481_s8 = smov 256   ;;  %s1245_s7 = int_to_ptr.hbm [resolvable:$true] %s1244_s7 }
  0x13   :  { %v1527_v23 = vand.u32 4294901760, %v89_v17  ;;  %v92_v30 = vsel %vm81_vm0, %v74_v27, 0  ;;  %v95_v37 = vsel %vm81_vm0, %v75_v34, 0  ;;  %v98_v44 = vsel %vm81_vm0, %v76_v41, 0  ;;  %v594_v27 = vld [vmem:[#allocation10 + $0x58] sm:$0xff]  ;;  %s1482_s9 = smov 16  }
  0x14   :  { %v125_v13 = vsub.f32 %v83_v5, %v1519_v7  ;;  %264 = vmatpush.msra.mxu2 %v204_v10  ;;  %123 = vmatpush.msra.mxu0 %v122_v4  ;;  %v205_v14 = vand.u32 4294901760, %v204_v10  ;;  %v211_v15 = vand.u32 4294901760, %v210_v11  ;;  %v133_v16 = vsub.f32 %v86_v8, %v1522_v12  ;;  %s1483_s3 = smov [#allocation12]   ;;  %s1257_s13 = sshll.u32 %s1972_s4, 4  ;;  %s1258_s13 = int_to_ptr.hbm [resolvable:$true] %s1257_s13 }
  0x15   :  { %326 = vmatpush.msra.mxu3 %v122_v4  ;;  %v141_v29 = vsub.f32 %v89_v17, %v1527_v23  ;;  %v1532_v33 = vand.u32 4294901760, %v92_v30  ;;  %v156_v40 = vand.u32 4294901760, %v95_v37  ;;  %v164_v47 = vand.u32 4294901760, %v98_v44  ;;  %s1255_s10 = sshll.u32 %s1483_s3, 4  ;;  %s1256_s10 = int_to_ptr.vmem [resolvable:$true] %s1255_s10 }
  0x16   :  { %v126_v18 = vand.u32 4294901760, %v125_v13  ;;  %267 = vmatpush.msra.mxu2 %v210_v11  ;;  %v206_v19 = vsub.f32 %v204_v10, %v205_v14  ;;  %393 = vmatpush.msrb.mxu0 %v205_v14  ;;  %v212_v20 = vsub.f32 %v210_v11, %v211_v15  ;;  %v134_v22 = vand.u32 4294901760, %v133_v16 }
  0x17   :  { %270 = vmatmul.f32.vlgmr.msra.gmra.mxu2 %v125_v13  ;;  %v142_v32 = vand.u32 4294901760, %v141_v29  ;;  %v149_v36 = vsub.f32 %v92_v30, %v1532_v33  ;;  %v157_v43 = vsub.f32 %v95_v37, %v156_v40  ;;  %v165_v50 = vsub.f32 %v98_v44, %v164_v47 }
  0x18   :  { %v127_v21 = vsub.f32 %v125_v13, %v126_v18  ;;  %330 = vmatmul.f32.vlgmr.msra.gmra.mxu3 %v126_v18  ;;  %v207_v24 = vand.u32 4294901760, %v206_v19  ;;  %v213_v25 = vand.u32 4294901760, %v212_v20  ;;  %397 = vmatpush.msrb.mxu0 %v211_v15  ;;  %v135_v28 = vsub.f32 %v133_v16, %v134_v22  ;;  %v596_v13 = vld [vmem:[#allocation10 + $0x68] sm:$0xff]  ;;  %v595_v19 = vld [vmem:[#allocation10 + $0x60] sm:$0xff] }
  0x19   :  { %v143_v35 = vsub.f32 %v141_v29, %v142_v32  ;;  %v150_v39 = vand.u32 4294901760, %v149_v36  ;;  %v158_v46 = vand.u32 4294901760, %v157_v43  ;;  %v101_v51 = vsel %vm81_vm0, %v77_v48, 0 }
  0x1a   :  { %v128_v26 = vand.u32 4294901760, %v127_v21  ;;  %208 = vmatpush.msra.mxu1 %v207_v24  ;;  %v136_v31 = vand.u32 4294901760, %v135_v28  ;;  %v166_v53 = vand.u32 4294901760, %v165_v50  ;;  %v172_v54 = vand.u32 4294901760, %v101_v51 }
  0x1b   :  { %v144_v38 = vand.u32 4294901760, %v143_v35  ;;  %v151_v42 = vsub.f32 %v149_v36, %v150_v39  ;;  %v159_v49 = vsub.f32 %v157_v43, %v158_v46  ;;  %v104_v58 = vsel %vm81_vm0, %v78_v55, 0 }
  0x1c   :  { %129 = vmatmul.f32.vlgmr.msra.gmra.mxu0 %v128_v26  ;;  %214 = vmatpush.msra.mxu1 %v213_v25  ;;  %v167_v56 = vsub.f32 %v165_v50, %v166_v53  ;;  %v173_v57 = vsub.f32 %v101_v51, %v172_v54  ;;  %v180_v61 = vand.u32 4294901760, %v104_v58  ;;  %v1571_v15 = vand.u32 4294901760, %v596_v13 }
  0x1d   :  { %216 = vmatmul.f32.vlgmr.msra.gmra.mxu1 %v1519_v7  ;;  %v152_v45 = vand.u32 4294901760, %v151_v42  ;;  %v160_v52 = vand.u32 4294901760, %v159_v49  ;;  %v1582_v21 = vand.u32 4294901760, %v595_v19  ;;  %v591_v42 = vld [vmem:[#allocation10 + $0x40] sm:$0xff] }
  0x1e   :  { %446 = vmatpush.msrb.mxu1 %v120_v3  ;;  %v168_v59 = vand.u32 4294901760, %v167_v56  ;;  %v174_v60 = vand.u32 4294901760, %v173_v57  ;;  %v181_v63 = vsub.f32 %v104_v58, %v180_v61  ;;  %v1580_v18 = vsub.f32 %v596_v13, %v1571_v15 }
  0x1f   :  { %275 = vmatmul.f32.gmra.mxu2 %v133_v16  ;;  %v1591_v24 = vsub.f32 %v595_v19, %v1582_v21 }
  0x20   :  { %336 = vmatmul.f32.gmra.mxu3 %v134_v22  ;;  %448 = vmatpush.msrb.mxu1 %v122_v4  ;;  %v175_v62 = vsub.f32 %v173_v57, %v174_v60  ;;  %v182_v1 = vand.u32 4294901760, %v181_v63  ;;  %v598_v4 = vld [vmem:[#allocation10 + $0x78] sm:$0xff] }
  0x21   :  { %v1550_v5 = vand.u32 4294901760, %v598_v4  ;;  %v716_v26 = vand.u32 4294901760, %v1591_v24 }
  0x22   :  { %v176_v0 = vand.u32 4294901760, %v175_v62  ;;  %v183_v2 = vsub.f32 %v181_v63, %v182_v1 }
  0x23   :  { %600 = vmatpush.msrb.mxu2 %v1550_v5  ;;  %v1554_v6 = vsub.f32 %v598_v4, %v1550_v5  ;;  %915 = vmatpush.msra.mxu1 %v1550_v5  ;;  %v717_v30 = vsub.f32 %v1591_v24, %v716_v26 }
  0x24   :  { %137 = vmatmul.f32.gmra.mxu0 %v136_v31  ;;  %v184_v3 = vand.u32 4294901760, %v183_v2  ;;  %v587_v2 = vld [vmem:[#allocation10 + $0x20] sm:$0xff] }
  0x25   :  { %220 = vmatmul.f32.gmra.mxu1 %v1522_v12  ;;  %v698_v9 = vand.u32 4294901760, %v1554_v6  ;;  %827 = vmatpush.msra.mxu0 %v1554_v6  ;;  %v718_v34 = vand.u32 4294901760, %v717_v30 }
  0x27   :  { %280 = vmatmul.f32.gmra.mxu2 %v141_v29  ;;  %v699_v11 = vsub.f32 %v1554_v6, %v698_v9  ;;  %v1599_v29 = vand.u32 4294901760, %v594_v27 }
  0x28   :  { %342 = vmatmul.f32.gmra.mxu3 %v142_v32 }
  0x29   :  { %v700_v14 = vand.u32 4294901760, %v699_v11  ;;  %v1608_v32 = vsub.f32 %v594_v27, %v1599_v29 }
  0x2b   :  { %701 = vmatpush.msrb.mxu3 %v700_v14  ;;  %v722_v37 = vand.u32 4294901760, %v1608_v32  ;;  %v586_v14 = vld [vmem:[#allocation10 + $0x18] sm:$0xff] }
  0x2c   :  { %145 = vmatmul.f32.gmra.mxu0 %v144_v38  ;;  %v592_v38 = vld [vmem:[#allocation10 + $0x48] sm:$0xff] }
  0x2d   :  { %224 = vmatmul.f32.gmra.mxu1 %v1527_v23  ;;  %v723_v41 = vsub.f32 %v1608_v32, %v722_v37 }
  0x2f   :  { %285 = vmatmul.f32.gmra.mxu2 %v149_v36 }
  0x30   :  { %348 = vmatmul.f32.gmra.mxu3 %v150_v39 }
  0x34   :  { %153 = vmatmul.f32.gmra.mxu0 %v152_v45  ;;  %v1632_v45 = vand.u32 4294901760, %v591_v42 }
  0x35   :  { %228 = vmatmul.f32.gmra.mxu1 %v1532_v33 }
  0x37   :  { %290 = vmatmul.f32.gmra.mxu2 %v157_v43 }
  0x38   :  { %354 = vmatmul.f32.gmra.mxu3 %v158_v46  ;;  %v724_v46 = vand.u32 4294901760, %v723_v41 }
  0x3c   :  { %161 = vmatmul.f32.gmra.mxu0 %v160_v52 }
  0x3d   :  { %232 = vmatmul.f32.gmra.mxu1 %v156_v40 }
  0x3f   :  { %295 = vmatmul.f32.gmra.mxu2 %v165_v50  ;;  %v1642_v50 = vsub.f32 %v591_v42, %v1632_v45 }
  0x40   :  { %360 = vmatmul.f32.gmra.mxu3 %v166_v53  ;;  %v589_v53 = vld [vmem:[#allocation10 + $0x30] sm:$0xff] }
  0x41   :  { %v740_v56 = vand.u32 4294901760, %v1642_v50 }
  0x43   :  { %v741_v62 = vsub.f32 %v1642_v50, %v740_v56 }
  0x44   :  { %169 = vmatmul.f32.gmra.mxu0 %v168_v59 }
  0x45   :  { %236 = vmatmul.f32.gmra.mxu1 %v164_v47 }
  0x47   :  { %300 = vmatmul.f32.gmra.mxu2 %v173_v57  ;;  %v1654_v57 = vand.u32 4294901760, %v589_v53 }
  0x48   :  { %366 = vmatmul.f32.gmra.mxu3 %v174_v60  ;;  %v588_v60 = vld [vmem:[#allocation10 + $0x28] sm:$0xff] }
  0x4c   :  { %177 = vmatmul.f32.gmra.mxu0 %v176_v0 }
  0x4d   :  { %240 = vmatmul.f32.gmra.mxu1 %v172_v54 }
  0x4f   :  { %305 = vmatmul.f32.gmra.mxu2 %v181_v63  ;;  %v1668_v63 = vsub.f32 %v589_v53, %v1654_v57  ;;  %v584_v53 = vld [vmem:[#allocation10 + $0x8] sm:$0xff] }
  0x50   :  { %372 = vmatmul.f32.gmra.mxu3 %v182_v1  ;;  %v1673_v1 = vand.u32 4294901760, %v588_v60 }
  0x51   :  { %v752_v4 = vand.u32 4294901760, %v1668_v63 }
  0x52   :  { %v1684_v13 = vsub.f32 %v588_v60, %v1673_v1  ;;  %v1724_v60 = vand.u32 4294901760, %v584_v53 }
  0x54   :  { %185 = vmatmul.f32.gmra.mxu0 %v184_v3  ;;  %v742_v3 = vand.u32 4294901760, %v741_v62 }
  0x55   :  { %244 = vmatmul.f32.gmra.mxu1 %v180_v61 }
  0x5c   :  { %399 = vmatmul.f32.vlgmr.msrb.gmra.mxu0 %v1519_v7 }
  0x5d   :  { %450 = vmatmul.f32.vlgmr.msrb.gmra.mxu1 %v1519_v7  ;;  %v597_v7 = vld [vmem:[#allocation10 + $0x70] sm:$0xff] }
  0x5e   :  { %v1557_v8 = vand.u32 4294901760, %v597_v7 }
  0x60   :  { %602 = vmatpush.msrb.mxu2 %v1557_v8  ;;  %v1563_v10 = vsub.f32 %v597_v7, %v1557_v8  ;;  %917 = vmatpush.msra.mxu1 %v1557_v8  ;;  %v1676_v7 = vand.u32 4294901760, %v587_v2 }
  0x62   :  { %830 = vmatpush.msra.mxu0 %v1563_v10  ;;  %604 = vmatpush.msrb.mxu2 %v1571_v15  ;;  %v1691_v19 = vsub.f32 %v587_v2, %v1676_v7  ;;  %v583_v2 = vld [vmem:[#allocation10] sm:$0xff] }
  0x63   :  { %919 = vmatpush.msra.mxu1 %v1571_v15 }
  0x64   :  { %403 = vmatmul.f32.gmra.mxu0 %v1522_v12  ;;  %606 = vmatpush.msrb.mxu2 %v1582_v21 }
  0x65   :  { %454 = vmatmul.f32.gmra.mxu1 %v1522_v12  ;;  %v704_v12 = vand.u32 4294901760, %v1563_v10  ;;  %833 = vmatpush.msra.mxu0 %v1580_v18 }
  0x66   :  { %921 = vmatpush.msra.mxu1 %v1582_v21  ;;  %608 = vmatpush.msrb.mxu2 %v1599_v29 }
  0x67   :  { %v705_v16 = vsub.f32 %v1563_v10, %v704_v12  ;;  %836 = vmatpush.msra.mxu0 %v1591_v24 }
  0x68   :  { %923 = vmatpush.msra.mxu1 %v1599_v29 }
  0x69   :  { %v706_v20 = vand.u32 4294901760, %v705_v16  ;;  %839 = vmatpush.msra.mxu0 %v1608_v32  ;;  %v753_v16 = vsub.f32 %v1668_v63, %v752_v4 }
  0x6b   :  { %707 = vmatpush.msrb.mxu3 %v706_v20  ;;  %v1693_v20 = vand.u32 4294901760, %v586_v14  ;;  %v754_v30 = vand.u32 4294901760, %v753_v16 }
  0x6c   :  { %407 = vmatmul.f32.gmra.mxu0 %v1527_v23 }
  0x6d   :  { %458 = vmatmul.f32.gmra.mxu1 %v1527_v23  ;;  %v710_v23 = vand.u32 4294901760, %v1580_v18 }
  0x6f   :  { %v711_v25 = vsub.f32 %v1580_v18, %v710_v23 }
  0x71   :  { %v712_v28 = vand.u32 4294901760, %v711_v25 }
  0x73   :  { %713 = vmatpush.msrb.mxu3 %v712_v28  ;;  %v758_v28 = vand.u32 4294901760, %v1684_v13 }
  0x74   :  { %411 = vmatmul.f32.gmra.mxu0 %v1532_v33 }
  0x75   :  { %462 = vmatmul.f32.gmra.mxu1 %v1532_v33  ;;  %v593_v33 = vld [vmem:[#allocation10 + $0x50] sm:$0xff]  ;;  %719 = vmatpush.msrb.mxu3 %v718_v34  ;;  %v1703_v34 = vsub.f32 %v586_v14, %v1693_v20  ;;  %v759_v42 = vsub.f32 %v1684_v13, %v758_v28  ;;  %v1736_v14 = vand.u32 4294901760, %v583_v2 }
  0x76   :  { %v1610_v35 = vand.u32 4294901760, %v593_v33 }
  0x77   :  { %725 = vmatpush.msrb.mxu3 %v724_v46 }
  0x78   :  { %610 = vmatpush.msrb.mxu2 %v1610_v35  ;;  %v1619_v39 = vsub.f32 %v593_v33, %v1610_v35  ;;  %925 = vmatpush.msra.mxu1 %v1610_v35  ;;  %v764_v33 = vand.u32 4294901760, %v1691_v19 }
  0x7a   :  { %v728_v43 = vand.u32 4294901760, %v1619_v39  ;;  %842 = vmatpush.msra.mxu0 %v1619_v39 }
  0x7c   :  { %415 = vmatmul.f32.gmra.mxu0 %v156_v40  ;;  %v729_v48 = vsub.f32 %v1619_v39, %v728_v43 }
  0x7d   :  { %466 = vmatmul.f32.gmra.mxu1 %v156_v40  ;;  %v1621_v40 = vand.u32 4294901760, %v592_v38 }
  0x7f   :  { %612 = vmatpush.msrb.mxu2 %v1621_v40  ;;  %v1630_v44 = vsub.f32 %v592_v38, %v1621_v40  ;;  %927 = vmatpush.msra.mxu1 %v1621_v40  ;;  %v585_v38 = vld [vmem:[#allocation10 + $0x10] sm:$0xff] }
  0x80   :  { %v1712_v46 = vand.u32 4294901760, %v585_v38 }
  0x81   :  { %v734_v49 = vand.u32 4294901760, %v1630_v44  ;;  %614 = vmatpush.msrb.mxu2 %v1632_v45  ;;  %845 = vmatpush.msra.mxu0 %v1630_v44 }
  0x82   :  { %929 = vmatpush.msra.mxu1 %v1632_v45 }
  0x83   :  { %v735_v55 = vsub.f32 %v1630_v44, %v734_v49  ;;  %848 = vmatpush.msra.mxu0 %v1642_v50  ;;  %v1479_v50 = vmov 0.0  }
  0x84   :  { %419 = vmatmul.f32.gmra.mxu0 %v164_v47 }
  0x85   :  { %470 = vmatmul.f32.gmra.mxu1 %v164_v47  ;;  %v590_v47 = vld [vmem:[#allocation10 + $0x38] sm:$0xff] }
  0x86   :  { %v1647_v52 = vand.u32 4294901760, %v590_v47 }
  0x88   :  { %616 = vmatpush.msrb.mxu2 %v1647_v52  ;;  %v1661_v59 = vsub.f32 %v590_v47, %v1647_v52  ;;  %931 = vmatpush.msra.mxu1 %v1647_v52  ;;  %v765_v47 = vsub.f32 %v1691_v19, %v764_v33 }
  0x8a   :  { %v746_v0 = vand.u32 4294901760, %v1661_v59  ;;  %618 = vmatpush.msrb.mxu2 %v1654_v57  ;;  %851 = vmatpush.msra.mxu0 %v1661_v59 }
  0x8b   :  { %933 = vmatpush.msra.mxu1 %v1654_v57 }
  0x8c   :  { %423 = vmatmul.f32.gmra.mxu0 %v172_v54  ;;  %v747_v11 = vsub.f32 %v1661_v59, %v746_v0  ;;  %620 = vmatpush.msrb.mxu2 %v1673_v1 }
  0x8d   :  { %474 = vmatmul.f32.gmra.mxu1 %v172_v54  ;;  %v730_v54 = vand.u32 4294901760, %v729_v48  ;;  %854 = vmatpush.msra.mxu0 %v1668_v63  ;;  %v770_v48 = vand.u32 4294901760, %v1703_v34 }
  0x8e   :  { %935 = vmatpush.msra.mxu1 %v1673_v1  ;;  %v748_v27 = vand.u32 4294901760, %v747_v11  ;;  %622 = vmatpush.msrb.mxu2 %v1676_v7  ;;  %v1733_v11 = vsub.f32 %v584_v53, %v1724_v60 }
  0x8f   :  { %731 = vmatpush.msrb.mxu3 %v730_v54  ;;  %857 = vmatpush.msra.mxu0 %v1684_v13  ;;  %v760_v54 = vand.u32 4294901760, %v759_v42  ;;  %v771_v62 = vsub.f32 %v1703_v34, %v770_v48  ;;  %v787_v42 = vsub.f32 %v583_v2, %v1736_v14 }
  0x90   :  { %937 = vmatpush.msra.mxu1 %v1676_v7  ;;  %624 = vmatpush.msrb.mxu2 %v1693_v20 }
  0x91   :  { %860 = vmatpush.msra.mxu0 %v1691_v19  ;;  %v772_v16 = vand.u32 4294901760, %v771_v62 }
  0x92   :  { %939 = vmatpush.msra.mxu1 %v1693_v20  ;;  %626 = vmatpush.msrb.mxu2 %v1712_v46 }
  0x93   :  { %863 = vmatpush.msra.mxu0 %v1703_v34 }
  0x94   :  { %427 = vmatmul.f32.gmra.mxu0 %v180_v61  ;;  %941 = vmatpush.msra.mxu1 %v1712_v46 }
  0x95   :  { %478 = vmatmul.f32.gmra.mxu1 %v180_v61  ;;  %v736_v61 = vand.u32 4294901760, %v735_v55  ;;  %v1721_v55 = vsub.f32 %v585_v38, %v1712_v46  ;;  %628 = vmatpush.msrb.mxu2 %v1724_v60  ;;  %v782_v38 = vand.u32 4294901760, %v1733_v11 }
  0x96   :  { %943 = vmatpush.msra.mxu1 %v1724_v60 }
  0x97   :  { %737 = vmatpush.msrb.mxu3 %v736_v61  ;;  %v766_v61 = vand.u32 4294901760, %v765_v47  ;;  %866 = vmatpush.msra.mxu0 %v1721_v55 }
  0x98   :  { %945 = vmatpush.msra.mxu1 %v1736_v14  ;;  %630 = vmatpush.msrb.mxu2 %v1736_v14 }
  0x99   :  { %v1576_v17 = vpop.f32.mrf.mxu0  ;;  %743 = vmatpush.msrb.mxu3 %v742_v3  ;;  %v1973_v3 = vand.u32 4294901760, %v1721_v55  ;;  %869 = vmatpush.msra.mxu0 %v1733_v11 }
  0x9a   :  { %v1585_v22 = vpop.f32.mrf.mxu1  ;;  %998 = vmatpush.msra.mxu2 %v698_v9 }
  0x9b   :  { %749 = vmatpush.msrb.mxu3 %v748_v27  ;;  %872 = vmatpush.msra.mxu0 %v787_v42  ;;  %v331_v9 = vpop.f32.mrf.mxu3 }
  0x9c   :  { %1002 = vmatpush.msra.mxu2 %v704_v12  ;;  %v218_v12 = vadd.f32 %v1585_v22, %v1576_v17  ;;  %v1974_v22 = vand.u32 4294901760, %v1721_v55 }
  0x9d   :  { %755 = vmatpush.msrb.mxu3 %v754_v30  ;;  %v777_v30 = vsub.f32 %v1721_v55, %v1973_v3 }
  0x9e   :  { %1006 = vmatpush.msra.mxu2 %v710_v23 }
  0x9f   :  { %761 = vmatpush.msrb.mxu3 %v760_v54  ;;  %v778_v53 = vand.u32 4294901760, %v777_v30  ;;  %v783_v54 = vsub.f32 %v1733_v11, %v782_v38  ;;  %v271_v11 = vpop.f32.mrf.mxu2 }
  0xa0   :  { %1010 = vmatpush.msra.mxu2 %v716_v26  ;;  %v272_v23 = vadd.f32 %v271_v11, %v218_v12 }
  0xa1   :  { %v1604_v31 = vpop.f32.mrf.mxu0  ;;  %767 = vmatpush.msrb.mxu3 %v766_v61  ;;  %v788_v61 = vand.u32 4294901760, %v787_v42  ;;  %v784_v62 = vand.u32 4294901760, %v783_v54 }
  0xa2   :  { %v1613_v36 = vpop.f32.mrf.mxu1  ;;  %1014 = vmatpush.msra.mxu2 %v722_v37  ;;  %v332_v24 = vadd.f32 %v331_v9, %v272_v23 }
  0xa3   :  { %773 = vmatpush.msrb.mxu3 %v772_v16  ;;  %v789_v2 = vsub.f32 %v787_v42, %v788_v61  ;;  %v222_v26 = vadd.f32 %v1613_v36, %v1604_v31 }
  0xa4   :  { %1018 = vmatpush.msra.mxu2 %v728_v43 }
  0xa5   :  { %779 = vmatpush.msrb.mxu3 %v778_v53  ;;  %v790_v3 = vand.u32 4294901760, %v789_v2 }
  0xa6   :  { %1022 = vmatpush.msra.mxu2 %v734_v49  ;;  %v1478_v49 = vmov 1.0  }
  0xa7   :  { %785 = vmatpush.msrb.mxu3 %v784_v62  ;;  %v276_v10 = vpop.f32.mrf.mxu2 }
  0xa8   :  { %1026 = vmatpush.msra.mxu2 %v740_v56  ;;  %v277_v39 = vadd.f32 %v276_v10, %v222_v26 }
  0xa9   :  { %v1645_v51 = vpop.f32.mrf.mxu0  ;;  %791 = vmatpush.msrb.mxu3 %v790_v3 }
  0xaa   :  { %v1657_v58 = vpop.f32.mrf.mxu1  ;;  %1030 = vmatpush.msra.mxu2 %v746_v0 }
  0xab   :  { %1093 = vmatpush.msra.mxu3 %v1550_v5  ;;  %v226_v36 = vadd.f32 %v1657_v58, %v1645_v51 }
  0xac   :  { %1034 = vmatpush.msra.mxu2 %v752_v4 }
  0xad   :  { %1095 = vmatpush.msra.mxu3 %v1557_v8 }
  0xae   :  { %1038 = vmatpush.msra.mxu2 %v758_v28 }
  0xaf   :  { %1097 = vmatpush.msra.mxu3 %v1571_v15  ;;  %v337_v15 = vpop.f32.mrf.mxu3  ;;  %v281_v17 = vpop.f32.mrf.mxu2 }
  0xb0   :  { %1042 = vmatpush.msra.mxu2 %v764_v33  ;;  %v338_v31 = vadd.f32 %v337_v15, %v277_v39  ;;  %v282_v51 = vadd.f32 %v281_v17, %v226_v36 }
  0xb1   :  { %v1696_v25 = vpop.f32.mrf.mxu0  ;;  %1099 = vmatpush.msra.mxu3 %v1582_v21 }
  0xb2   :  { %v1706_v41 = vpop.f32.mrf.mxu1  ;;  %1046 = vmatpush.msra.mxu2 %v770_v48 }
  0xb3   :  { %1101 = vmatpush.msra.mxu3 %v1599_v29  ;;  %v230_v19 = vadd.f32 %v1706_v41, %v1696_v25 }
  0xb4   :  { %1050 = vmatpush.msra.mxu2 %v1974_v22 }
  0xb5   :  { %1103 = vmatpush.msra.mxu3 %v1610_v35 }
  0xb6   :  { %1054 = vmatpush.msra.mxu2 %v782_v38 }
  0xb7   :  { %1105 = vmatpush.msra.mxu3 %v1621_v40  ;;  %v343_v35 = vpop.f32.mrf.mxu3  ;;  %v286_v44 = vpop.f32.mrf.mxu2 }
  0xb8   :  { %1058 = vmatpush.msra.mxu2 %v788_v61  ;;  %v344_v13 = vadd.f32 %v343_v35, %v282_v51 }
  0xb9   :  { %v1740_v27 = vpop.f32.mrf.mxu0  ;;  %1107 = vmatpush.msra.mxu3 %v1632_v45 }
  0xba   :  { %v1750_v47 = vpop.f32.mrf.mxu1 }
  0xbb   :  { %1109 = vmatpush.msra.mxu3 %v1647_v52  ;;  %v234_v38 = vadd.f32 %v1750_v47, %v1740_v27 }
  0xbd   :  { %1111 = vmatpush.msra.mxu3 %v1654_v57 }
  0xbf   :  { %1113 = vmatpush.msra.mxu3 %v1673_v1  ;;  %v349_v1 = vpop.f32.mrf.mxu3  ;;  %v291_v34 = vpop.f32.mrf.mxu2 }
  0xc0   :  { %v292_v10 = vadd.f32 %v291_v34, %v234_v38 }
  0xc1   :  { %v1759_v16 = vpop.f32.mrf.mxu0  ;;  %1115 = vmatpush.msra.mxu3 %v1676_v7 }
  0xc2   :  { %v1764_v6 = vpop.f32.mrf.mxu1 }
  0xc3   :  { %1117 = vmatpush.msra.mxu3 %v1693_v20  ;;  %v238_v26 = vadd.f32 %v1764_v6, %v1759_v16 }
  0xc5   :  { %1119 = vmatpush.msra.mxu3 %v1712_v46 }
  0xc7   :  { %1121 = vmatpush.msra.mxu3 %v1724_v60  ;;  %v287_v60 = vadd.f32 %v286_v44, %v230_v19  ;;  %v355_v42 = vpop.f32.mrf.mxu3  ;;  %v296_v15 = vpop.f32.mrf.mxu2 }
  0xc8   :  { %v297_v44 = vadd.f32 %v296_v15, %v238_v26 }
  0xc9   :  { %v1775_v5 = vpop.f32.mrf.mxu0  ;;  %1123 = vmatpush.msra.mxu3 %v1736_v14  ;;  %v350_v53 = vadd.f32 %v349_v1, %v287_v60 }
  0xca   :  { %v1780_v8 = vpop.f32.mrf.mxu1 }
  0xcf   :  { %v301_v6 = vpop.f32.mrf.mxu2 }
  0xd1   :  { %v1793_v18 = vpop.f32.mrf.mxu0 }
  0xd2   :  { %v1798_v21 = vpop.f32.mrf.mxu1 }
  0xd9   :  { %v400_v29 = vpop.f32.mrf.mxu0 }
  0xda   :  { %v401_v32 = vadd.f32 %v400_v29, %v332_v24  ;;  %v451_v37 = vpop.f32.mrf.mxu1  ;;  %v356_v29 = vadd.f32 %v355_v42, %v292_v10 }
  0xdc   :  { %v452_v40 = vadd.f32 %v451_v37, %v401_v32  ;;  %v361_v37 = vpop.f32.mrf.mxu3 }
  0xde   :  { %482 = vst [vmem:[#allocation11] sm:$0xff] %v452_v40  ;;  %v1811_v43 = vadd.f32 -1.0, %v452_v40  ;;  %v504_v63 = vmul.f32 0.9, %v452_v40 }
  0xdf   :  { %502 = vst [vmem:[#allocation11 + $0x8] sm:$0xff] %v452_v40 }
  0xe0   :  { %vm499_vm1 = vcmp.gt.f32.partialorder %v1811_v43, 0.0 }
  0xe1   :  { %v404_v45 = vpop.f32.mrf.mxu0  ;;  %1310 = vmatmul.msk.f32.vlgmr.msrb.gmra.mxu3 %vm499_vm1, %v1478_v49  ;;  %v1279_v52 = vsel %vm499_vm1, 1.0, %v1479_v50 }
  0xe2   :  { %v405_v56 = vadd.f32 %v404_v45, %v338_v31  ;;  %v632_v57 = vsub.f32 %v1279_v52, %v1279_v52  ;;  %v455_v59 = vpop.f32.mrf.mxu1 }
  0xe4   :  { %v456_v58 = vadd.f32 %v455_v59, %v405_v56  ;;  %875 = vmatmul.f32.vlgmr.msra.gmra.mxu0 %v632_v57  ;;  %v633_v0 = vand.u32 4294901760, %v632_v57 }
  0xe6   :  { %483 = vst [vmem:[#allocation11 + $0x10] sm:$0xff] %v456_v58  ;;  %v505_v4 = vadd.f32 %v504_v63, %v456_v58  ;;  %949 = vmatmul.f32.vlgmr.msra.gmra.mxu1 %v633_v0  ;;  %v634_v7 = vsub.f32 %v632_v57, %v633_v0  ;;  %v242_v58 = vadd.f32 %v1780_v8, %v1775_v5 }
  0xe7   :  { %v362_v63 = vadd.f32 %v361_v37, %v297_v44 }
  0xe8   :  { %v506_v20 = vsub.f32 %v505_v4, %v1279_v52  ;;  %v635_v28 = vand.u32 4294901760, %v634_v7 }
  0xe9   :  { %v408_v33 = vpop.f32.mrf.mxu0 }
  0xea   :  { %512 = vst [vmem:[#allocation11 + $0x18] sm:$0xff] %v506_v20  ;;  %v409_v46 = vadd.f32 %v408_v33, %v344_v13  ;;  %636 = vmatmul.f32.vlgmr.msrb.gmra.mxu2 %v635_v28  ;;  %v1826_v48 = vadd.f32 -1.0, %v506_v20  ;;  %v459_v55 = vpop.f32.mrf.mxu1  ;;  %v514_v14 = vmul.f32 0.9, %v506_v20  ;;  %v302_v20 = vadd.f32 %v301_v6, %v242_v58  ;;  %v367_v28 = vpop.f32.mrf.mxu3 }
  0xec   :  { %v460_v3 = vadd.f32 %v459_v55, %v409_v46  ;;  %vm508_vm2 = vcmp.gt.f32.partialorder %v1826_v48, 0.0 }
  0xed   :  { %v1281_v30 = vsel %vm508_vm2, 1.0, %v1479_v50  ;;  %1311 = vmatmul.msk.f32.gmra.mxu3 %vm508_vm2, %v1478_v49 }
  0xee   :  { %484 = vst [vmem:[#allocation11 + $0x20] sm:$0xff] %v460_v3  ;;  %v515_v25 = vadd.f32 %v514_v14, %v460_v3  ;;  %v640_v41 = vsub.f32 %v1281_v30, %v1281_v30  ;;  %v246_v3 = vadd.f32 %v1798_v21, %v1793_v18  ;;  %v368_v14 = vadd.f32 %v367_v28, %v302_v20 }
  0xf0   :  { %v516_v54 = vsub.f32 %v515_v25, %v1281_v30  ;;  %880 = vmatmul.f32.gmra.mxu0 %v640_v41  ;;  %v641_v61 = vand.u32 4294901760, %v640_v41  ;;  %v306_v30 = vpop.f32.mrf.mxu2 }
  0xf1   :  { %v412_v62 = vpop.f32.mrf.mxu0 }
  0xf2   :  { %522 = vst [vmem:[#allocation11 + $0x28] sm:$0xff] %v516_v54  ;;  %v413_v2 = vadd.f32 %v412_v62, %v350_v53  ;;  %955 = vmatmul.f32.gmra.mxu1 %v641_v61  ;;  %v1837_v11 = vadd.f32 -1.0, %v516_v54  ;;  %v642_v9 = vsub.f32 %v640_v41, %v641_v61  ;;  %v463_v12 = vpop.f32.mrf.mxu1  ;;  %v524_v17 = vmul.f32 0.9, %v516_v54  ;;  %v373_v18 = vpop.f32.mrf.mxu3 }
  0xf3   :  { %v307_v61 = vadd.f32 %v306_v30, %v246_v3 }
  0xf4   :  { %v464_v23 = vadd.f32 %v463_v12, %v413_v2  ;;  %vm518_vm3 = vcmp.gt.f32.partialorder %v1837_v11, 0.0  ;;  %v643_v27 = vand.u32 4294901760, %v642_v9 }
  0xf5   :  { %v1283_v47 = vsel %vm518_vm3, 1.0, %v1479_v50  ;;  %1312 = vmatmul.msk.f32.gmra.mxu3 %vm518_vm3, %v1478_v49 }
  0xf6   :  { %485 = vst [vmem:[#allocation11 + $0x30] sm:$0xff] %v464_v23  ;;  %v525_v22 = vadd.f32 %v524_v17, %v464_v23  ;;  %644 = vmatmul.f32.gmra.mxu2 %v643_v27  ;;  %v648_v24 = vsub.f32 %v1283_v47, %v1283_v47  ;;  %v374_v23 = vadd.f32 %v373_v18, %v307_v61 }
  0xf8   :  { %v526_v32 = vsub.f32 %v525_v22, %v1283_v47  ;;  %885 = vmatmul.f32.gmra.mxu0 %v648_v24  ;;  %v649_v35 = vand.u32 4294901760, %v648_v24 }
  0xf9   :  { %v416_v39 = vpop.f32.mrf.mxu0 }
  0xfa   :  { %532 = vst [vmem:[#allocation11 + $0x38] sm:$0xff] %v526_v32  ;;  %v417_v40 = vadd.f32 %v416_v39, %v356_v29  ;;  %961 = vmatmul.f32.gmra.mxu1 %v649_v35  ;;  %v1848_v31 = vadd.f32 -1.0, %v526_v32  ;;  %v650_v36 = vsub.f32 %v648_v24, %v649_v35  ;;  %v467_v45 = vpop.f32.mrf.mxu1  ;;  %v534_v56 = vmul.f32 0.9, %v526_v32 }
  0xfc   :  { %v468_v52 = vadd.f32 %v467_v45, %v417_v40  ;;  %vm528_vm4 = vcmp.gt.f32.partialorder %v1848_v31, 0.0  ;;  %v651_v57 = vand.u32 4294901760, %v650_v36 }
  0xfd   :  { %v1285_v16 = vsel %vm528_vm4, 1.0, %v1479_v50  ;;  %1313 = vmatmul.msk.f32.gmra.mxu3 %vm528_vm4, %v1478_v49 }
  0xfe   :  { %486 = vst [vmem:[#allocation11 + $0x40] sm:$0xff] %v468_v52  ;;  %v535_v59 = vadd.f32 %v534_v56, %v468_v52  ;;  %652 = vmatmul.f32.gmra.mxu2 %v651_v57  ;;  %v656_v51 = vsub.f32 %v1285_v16, %v1285_v16 }
 0x100   :  { %v536_v0 = vsub.f32 %v535_v59, %v1285_v16  ;;  %890 = vmatmul.f32.gmra.mxu0 %v656_v51  ;;  %v657_v1 = vand.u32 4294901760, %v656_v51 }
 0x101   :  { %v420_v4 = vpop.f32.mrf.mxu0 }
 0x102   :  { %542 = vst [vmem:[#allocation11 + $0x48] sm:$0xff] %v536_v0  ;;  %v421_v7 = vadd.f32 %v420_v4, %v362_v63  ;;  %967 = vmatmul.f32.gmra.mxu1 %v657_v1  ;;  %v1859_v13 = vadd.f32 -1.0, %v536_v0  ;;  %v658_v19 = vsub.f32 %v656_v51, %v657_v1  ;;  %v471_v33 = vpop.f32.mrf.mxu1  ;;  %v544_v46 = vmul.f32 0.9, %v536_v0 }
 0x104   :  { %v472_v34 = vadd.f32 %v471_v33, %v421_v7  ;;  %vm538_vm5 = vcmp.gt.f32.partialorder %v1859_v13, 0.0  ;;  %v659_v55 = vand.u32 4294901760, %v658_v19 }
 0x105   :  { %v1287_v5 = vsel %vm538_vm5, 1.0, %v1479_v50  ;;  %1314 = vmatmul.msk.f32.gmra.mxu3 %vm538_vm5, %v1478_v49 }
 0x106   :  { %487 = vst [vmem:[#allocation11 + $0x50] sm:$0xff] %v472_v34  ;;  %v545_v8 = vadd.f32 %v544_v46, %v472_v34  ;;  %660 = vmatmul.f32.gmra.mxu2 %v659_v55  ;;  %v664_v60 = vsub.f32 %v1287_v5, %v1287_v5 }
 0x108   :  { %v546_v25 = vsub.f32 %v545_v8, %v1287_v5  ;;  %895 = vmatmul.f32.gmra.mxu0 %v664_v60  ;;  %v665_v41 = vand.u32 4294901760, %v664_v60 }
 0x109   :  { %v424_v38 = vpop.f32.mrf.mxu0 }
 0x10a   :  { %552 = vst [vmem:[#allocation11 + $0x58] sm:$0xff] %v546_v25  ;;  %v425_v42 = vadd.f32 %v424_v38, %v368_v14  ;;  %973 = vmatmul.f32.gmra.mxu1 %v665_v41  ;;  %v1870_v53 = vadd.f32 -1.0, %v546_v25  ;;  %v666_v54 = vsub.f32 %v664_v60, %v665_v41  ;;  %v475_v62 = vpop.f32.mrf.mxu1  ;;  %v554_v9 = vmul.f32 0.9, %v546_v25 }
 0x10c   :  { %v476_v2 = vadd.f32 %v475_v62, %v425_v42  ;;  %vm548_vm6 = vcmp.gt.f32.partialorder %v1870_v53, 0.0  ;;  %v667_v10 = vand.u32 4294901760, %v666_v54 }
 0x10d   :  { %v1289_v21 = vsel %vm548_vm6, 1.0, %v1479_v50  ;;  %1315 = vmatmul.msk.f32.gmra.mxu3 %vm548_vm6, %v1478_v49 }
 0x10e   :  { %488 = vst [vmem:[#allocation11 + $0x60] sm:$0xff] %v476_v2  ;;  %v555_v12 = vadd.f32 %v554_v9, %v476_v2  ;;  %668 = vmatmul.f32.gmra.mxu2 %v667_v10  ;;  %v672_v15 = vsub.f32 %v1289_v21, %v1289_v21 }
 0x110   :  { %v556_v17 = vsub.f32 %v555_v12, %v1289_v21  ;;  %900 = vmatmul.f32.gmra.mxu0 %v672_v15  ;;  %v673_v27 = vand.u32 4294901760, %v672_v15 }
 0x111   :  { %v428_v47 = vpop.f32.mrf.mxu0 }
 0x112   :  { %562 = vst [vmem:[#allocation11 + $0x68] sm:$0xff] %v556_v17  ;;  %v429_v22 = vadd.f32 %v428_v47, %v374_v23  ;;  %979 = vmatmul.f32.gmra.mxu1 %v673_v27  ;;  %v1290_v24 = vadd.f32 -1.0, %v556_v17  ;;  %v674_v26 = vsub.f32 %v672_v15, %v673_v27  ;;  %v479_v29 = vpop.f32.mrf.mxu1  ;;  %v564_v35 = vmul.f32 0.9, %v556_v17 }
 0x114   :  { %v480_v32 = vadd.f32 %v479_v29, %v429_v22  ;;  %vm558_vm7 = vcmp.gt.f32.partialorder %v1290_v24, 0.0  ;;  %v675_v37 = vand.u32 4294901760, %v674_v26 }
 0x115   :  { %1316 = vmatmul.msk.f32.gmra.mxu3 %vm558_vm7, %v1478_v49  ;;  %v1291_v39 = vsel %vm558_vm7, 1.0, %v1479_v50 }
 0x116   :  { %489 = vst [vmem:[#allocation11 + $0x70] sm:$0xff] %v480_v32  ;;  %v565_v40 = vadd.f32 %v564_v35, %v480_v32  ;;  %676 = vmatmul.f32.gmra.mxu2 %v675_v37  ;;  %v680_v36 = vsub.f32 %v1291_v39, %v1291_v39 }
 0x118   :  { %905 = vmatmul.f32.gmra.mxu0 %v680_v36  ;;  %v681_v44 = vand.u32 4294901760, %v680_v36  ;;  %v566_v45 = vsub.f32 %v565_v40, %v1291_v39 }
 0x11a   :  { %985 = vmatmul.f32.gmra.mxu1 %v681_v44  ;;  %v1292_v52 = vadd.f32 -1.0, %v566_v45  ;;  %572 = vst [vmem:[#allocation11 + $0x78] sm:$0xff] %v566_v45  ;;  %v682_v56 = vsub.f32 %v680_v36, %v681_v44 }
 0x11b   :  { %1250 = dma.vmem_to_hbm [thread:$0]  %s1243_s2, 2048, %s1245_s7, [#allocation7], %s1481_s8, %s1481_s8, %s1482_s9  }
 0x11c   :  { %vm568_vm8 = vcmp.gt.f32.partialorder %v1292_v52, 0.0  ;;  %v683_v57 = vand.u32 4294901760, %v682_v56 }
 0x11d   :  { %1317 = vmatmul.msk.f32.gmra.mxu3 %vm568_vm8, %v1478_v49  ;;  %v1293_v16 = vsel %vm568_vm8, 1.0, %v1479_v50 }
 0x11e   :  { %684 = vmatmul.f32.gmra.mxu2 %v683_v57  ;;  %v688_v6 = vsub.f32 %v1293_v16, %v1293_v16 }
 0x120   :  { %910 = vmatmul.f32.gmra.mxu0 %v688_v6  ;;  %v689_v59 = vand.u32 4294901760, %v688_v6 }
 0x122   :  { %991 = vmatmul.f32.gmra.mxu1 %v689_v59  ;;  %v690_v51 = vsub.f32 %v688_v6, %v689_v59 }
 0x124   :  { %v691_v58 = vand.u32 4294901760, %v690_v51 }
 0x125   :  { %1326 = vmatmul.msk.f32.vlgmr.msra.gmra.mxu3 %vm499_vm1, %v1478_v49 }
 0x126   :  { %692 = vmatmul.f32.gmra.mxu2 %v691_v58 }
 0x12d   :  { %1327 = vmatmul.msk.f32.gmra.mxu3 %vm508_vm2, %v1478_v49 }
 0x12e   :  { %1318 = vmatmul.msk.f32.vlgmr.msra.gmra.mxu2 %vm499_vm1, %v1478_v49 }
 0x135   :  { %1328 = vmatmul.msk.f32.gmra.mxu3 %vm518_vm3, %v1478_v49 }
 0x136   :  { %1319 = vmatmul.msk.f32.gmra.mxu2 %vm508_vm2, %v1478_v49 }
 0x13d   :  { %1329 = vmatmul.msk.f32.gmra.mxu3 %vm528_vm4, %v1478_v49 }
 0x13e   :  { %1320 = vmatmul.msk.f32.gmra.mxu2 %vm518_vm3, %v1478_v49 }
 0x145   :  { %1330 = vmatmul.msk.f32.gmra.mxu3 %vm538_vm5, %v1478_v49 }
 0x146   :  { %1321 = vmatmul.msk.f32.gmra.mxu2 %vm528_vm4, %v1478_v49 }
 0x14d   :  { %1331 = vmatmul.msk.f32.gmra.mxu3 %vm548_vm6, %v1478_v49 }
 0x14e   :  { %1322 = vmatmul.msk.f32.gmra.mxu2 %vm538_vm5, %v1478_v49 }
 0x155   :  { %1332 = vmatmul.msk.f32.gmra.mxu3 %vm558_vm7, %v1478_v49 }
 0x156   :  { %1323 = vmatmul.msk.f32.gmra.mxu2 %vm548_vm6, %v1478_v49 }
 0x15d   :  { %1333 = vmatmul.msk.f32.gmra.mxu3 %vm568_vm8, %v1478_v49 }
 0x15e   :  { %1324 = vmatmul.msk.f32.gmra.mxu2 %vm558_vm7, %v1478_v49 }
 0x161   :  { %v876_v28 = vpop.f32.mrf.mxu0 }
 0x163   :  { %v950_v46 = vpop.f32.mrf.mxu1 }
 0x164   :  { %v794_v43 = vpop.f32.mrf.mxu3 }
 0x166   :  { %1325 = vmatmul.msk.f32.gmra.mxu2 %vm568_vm8, %v1478_v49 }
 0x16d   :  { %v637_v11 = vpop.f32.mrf.mxu2  ;;  %v881_v55 = vpop.f32.mrf.mxu0 }
 0x16e   :  { %v795_v5 = vadd.f32 %v794_v43, %v637_v11 }
 0x16f   :  { %v956_v3 = vpop.f32.mrf.mxu1 }
 0x170   :  { %v798_v48 = vpop.f32.mrf.mxu3  ;;  %v877_v14 = vadd.f32 %v876_v28, %v795_v5 }
 0x172   :  { %v951_v41 = vadd.f32 %v950_v46, %v877_v14 }
 0x175   :  { %v886_v38 = vpop.f32.mrf.mxu0 }
 0x177   :  { %v962_v62 = vpop.f32.mrf.mxu1 }
 0x178   :  { %v802_v31 = vpop.f32.mrf.mxu3 }
 0x179   :  { %v645_v63 = vpop.f32.mrf.mxu2 }
 0x17a   :  { %v799_v30 = vadd.f32 %v798_v48, %v645_v63 }
 0x17c   :  { %v882_v54 = vadd.f32 %v881_v55, %v799_v30 }
 0x17d   :  { %v891_v15 = vpop.f32.mrf.mxu0 }
 0x17e   :  { %v957_v9 = vadd.f32 %v956_v3, %v882_v54 }
 0x17f   :  { %v968_v22 = vpop.f32.mrf.mxu1 }
 0x180   :  { %v806_v49 = vpop.f32.mrf.mxu3 }
 0x181   :  { %v653_v0 = vpop.f32.mrf.mxu2 }
 0x182   :  { %v803_v2 = vadd.f32 %v802_v31, %v653_v0 }
 0x184   :  { %v887_v23 = vadd.f32 %v886_v38, %v803_v2 }
 0x185   :  { %v896_v52 = vpop.f32.mrf.mxu0 }
 0x186   :  { %v963_v32 = vadd.f32 %v962_v62, %v887_v23 }
 0x187   :  { %v974_v51 = vpop.f32.mrf.mxu1 }
 0x188   :  { %v810_v1 = vpop.f32.mrf.mxu3 }
 0x189   :  { %v661_v4 = vpop.f32.mrf.mxu2 }
 0x18a   :  { %v807_v26 = vadd.f32 %v806_v49, %v661_v4 }
 0x18c   :  { %v892_v36 = vadd.f32 %v891_v15, %v807_v26 }
 0x18d   :  { %v901_v4 = vpop.f32.mrf.mxu0 }
 0x18e   :  { %v969_v59 = vadd.f32 %v968_v22, %v892_v36 }
 0x18f   :  { %v980_v3 = vpop.f32.mrf.mxu1 }
 0x190   :  { %v1937_v7 = vpop.f32.mrf.mxu3 }
 0x191   :  { %v669_v13 = vpop.f32.mrf.mxu2 }
 0x192   :  { %v811_v16 = vadd.f32 %v810_v1, %v669_v13 }
 0x194   :  { %v897_v11 = vadd.f32 %v896_v52, %v811_v16 }
 0x195   :  { %v906_v54 = vpop.f32.mrf.mxu0 }
 0x196   :  { %v975_v46 = vadd.f32 %v974_v51, %v897_v11 }
 0x198   :  { %v1939_v19 = vpop.f32.mrf.mxu3 }
 0x199   :  { %v1941_v20 = vpop.f32.mrf.mxu2 }
 0x19a   :  { %v815_v1 = vadd.f32 %v1937_v7, %v1941_v20 }
 0x19c   :  { %v902_v14 = vadd.f32 %v901_v4, %v815_v1 }
 0x19e   :  { %v981_v20 = vadd.f32 %v980_v3, %v902_v14 }
 0x1a0   :  { %v1943_v33 = vpop.f32.mrf.mxu3 }
 0x1a1   :  { %v1945_v34 = vpop.f32.mrf.mxu2 }
 0x1a8   :  { %v1126_v8 = vpop.f32.mrf.mxu3 }
 0x1a9   :  { %v1947_v60 = vpop.f32.mrf.mxu2 }
 0x1aa   :  { %v823_v23 = vadd.f32 %v1943_v33, %v1947_v60 }
 0x1b0   :  { %v1130_v25 = vpop.f32.mrf.mxu3 }
 0x1b1   :  { %v1061_v42 = vpop.f32.mrf.mxu2 }
 0x1b2   :  { %v1062_v53 = vadd.f32 %v1061_v42, %v951_v41 }
 0x1b4   :  { %v1127_v61 = vadd.f32 %v1126_v8, %v1062_v53  ;;  %v819_v53 = vadd.f32 %v1939_v19, %v1945_v34 }
 0x1b6   :  { %1157 = vst [vmem:[#allocation12] sm:$0xff] %v1127_v61  ;;  %v1296_v10 = vadd.f32 -1.0, %v1127_v61  ;;  %v1178_v27 = vmul.f32 0.8, %v1127_v61 }
 0x1b7   :  { %1173 = vst [vmem:[#allocation12 + $0x8] sm:$0xff] %v1127_v61 }
 0x1b8   :  { %v1134_v18 = vpop.f32.mrf.mxu3  ;;  %vm1175_vm9 = vcmp.gt.f32.partialorder %v1296_v10, 0.0 }
 0x1b9   :  { %v1065_v21 = vpop.f32.mrf.mxu2  ;;  %v1297_v24 = vsel %vm1175_vm9, 1.0, %v1479_v50 }
 0x1ba   :  { %v1066_v12 = vadd.f32 %v1065_v21, %v957_v9  ;;  %v907_v9 = vadd.f32 %v906_v54, %v819_v53  ;;  %v986_v21 = vpop.f32.mrf.mxu1 }
 0x1bc   :  { %v1131_v17 = vadd.f32 %v1130_v25, %v1066_v12  ;;  %v987_v34 = vadd.f32 %v986_v21, %v907_v9 }
 0x1be   :  { %1158 = vst [vmem:[#allocation12 + $0x10] sm:$0xff] %v1131_v17  ;;  %v1179_v47 = vadd.f32 %v1178_v27, %v1131_v17 }
 0x1c0   :  { %v1180_v29 = vsub.f32 %v1179_v47, %v1297_v24  ;;  %v1138_v40 = vpop.f32.mrf.mxu3  ;;  %v911_v24 = vpop.f32.mrf.mxu0 }
 0x1c1   :  { %v1069_v35 = vpop.f32.mrf.mxu2  ;;  %v912_v26 = vadd.f32 %v911_v24, %v823_v23 }
 0x1c2   :  { %1182 = vst [vmem:[#allocation12 + $0x18] sm:$0xff] %v1180_v29  ;;  %v1070_v37 = vadd.f32 %v1069_v35, %v963_v32  ;;  %v1298_v39 = vadd.f32 -1.0, %v1180_v29  ;;  %v1187_v45 = vmul.f32 0.8, %v1180_v29 }
 0x1c4   :  { %v1135_v44 = vadd.f32 %v1134_v18, %v1070_v37  ;;  %vm1184_vm10 = vcmp.gt.f32.partialorder %v1298_v39, 0.0  ;;  %v992_v37 = vpop.f32.mrf.mxu1 }
 0x1c5   :  { %v1299_v57 = vsel %vm1184_vm10, 1.0, %v1479_v50  ;;  %v993_v36 = vadd.f32 %v992_v37, %v912_v26 }
 0x1c6   :  { %1159 = vst [vmem:[#allocation12 + $0x20] sm:$0xff] %v1135_v44  ;;  %v1188_v56 = vadd.f32 %v1187_v45, %v1135_v44 }
 0x1c8   :  { %v1189_v6 = vsub.f32 %v1188_v56, %v1299_v57  ;;  %v1142_v49 = vpop.f32.mrf.mxu3 }
 0x1c9   :  { %v1073_v58 = vpop.f32.mrf.mxu2 }
 0x1ca   :  { %1191 = vst [vmem:[#allocation12 + $0x28] sm:$0xff] %v1189_v6  ;;  %v1074_v43 = vadd.f32 %v1073_v58, %v969_v59  ;;  %v1300_v48 = vadd.f32 -1.0, %v1189_v6  ;;  %v1196_v63 = vmul.f32 0.8, %v1189_v6 }
 0x1cc   :  { %v1139_v31 = vadd.f32 %v1138_v40, %v1074_v43  ;;  %vm1193_vm11 = vcmp.gt.f32.partialorder %v1300_v48, 0.0 }
 0x1cd   :  { %v1301_v28 = vsel %vm1193_vm11, 1.0, %v1479_v50 }
 0x1ce   :  { %1160 = vst [vmem:[#allocation12 + $0x30] sm:$0xff] %v1139_v31  ;;  %v1197_v0 = vadd.f32 %v1196_v63, %v1139_v31 }
 0x1d0   :  { %v1198_v13 = vsub.f32 %v1197_v0, %v1301_v28  ;;  %v1146_v38 = vpop.f32.mrf.mxu3 }
 0x1d1   :  { %v1077_v55 = vpop.f32.mrf.mxu2 }
 0x1d2   :  { %1200 = vst [vmem:[#allocation12 + $0x38] sm:$0xff] %v1198_v13  ;;  %v1078_v5 = vadd.f32 %v1077_v55, %v975_v46  ;;  %v1302_v8 = vadd.f32 -1.0, %v1198_v13  ;;  %v1205_v25 = vmul.f32 0.8, %v1198_v13 }
 0x1d4   :  { %v1143_v30 = vadd.f32 %v1142_v49, %v1078_v5  ;;  %vm1202_vm12 = vcmp.gt.f32.partialorder %v1302_v8, 0.0 }
 0x1d5   :  { %v1303_v42 = vsel %vm1202_vm12, 1.0, %v1479_v50 }
 0x1d6   :  { %1161 = vst [vmem:[#allocation12 + $0x40] sm:$0xff] %v1143_v30  ;;  %v1206_v41 = vadd.f32 %v1205_v25, %v1143_v30 }
 0x1d8   :  { %v1207_v7 = vsub.f32 %v1206_v41, %v1303_v42  ;;  %v1150_v17 = vpop.f32.mrf.mxu3 }
 0x1d9   :  { %v1081_v61 = vpop.f32.mrf.mxu2 }
 0x1da   :  { %1209 = vst [vmem:[#allocation12 + $0x48] sm:$0xff] %v1207_v7  ;;  %v1082_v62 = vadd.f32 %v1081_v61, %v981_v20  ;;  %v1304_v2 = vadd.f32 -1.0, %v1207_v7  ;;  %v1214_v18 = vmul.f32 0.8, %v1207_v7 }
 0x1dc   :  { %v1147_v10 = vadd.f32 %v1146_v38, %v1082_v62  ;;  %vm1211_vm13 = vcmp.gt.f32.partialorder %v1304_v2, 0.0 }
 0x1dd   :  { %v1305_v15 = vsel %vm1211_vm13, 1.0, %v1479_v50 }
 0x1de   :  { %1162 = vst [vmem:[#allocation12 + $0x50] sm:$0xff] %v1147_v10  ;;  %v1215_v12 = vadd.f32 %v1214_v18, %v1147_v10 }
 0x1e0   :  { %v1216_v19 = vsub.f32 %v1215_v12, %v1305_v15  ;;  %v1154_v45 = vpop.f32.mrf.mxu3 }
 0x1e1   :  { %v1085_v27 = vpop.f32.mrf.mxu2 }
 0x1e2   :  { %1218 = vst [vmem:[#allocation12 + $0x58] sm:$0xff] %v1216_v19  ;;  %v1086_v47 = vadd.f32 %v1085_v27, %v987_v34  ;;  %v1306_v22 = vadd.f32 -1.0, %v1216_v19  ;;  %v1223_v32 = vmul.f32 0.8, %v1216_v19 }
 0x1e4   :  { %v1151_v29 = vadd.f32 %v1150_v17, %v1086_v47  ;;  %vm1220_vm14 = vcmp.gt.f32.partialorder %v1306_v22, 0.0 }
 0x1e5   :  { %v1307_v39 = vsel %vm1220_vm14, 1.0, %v1479_v50 }
 0x1e6   :  { %1163 = vst [vmem:[#allocation12 + $0x60] sm:$0xff] %v1151_v29  ;;  %v1224_v35 = vadd.f32 %v1223_v32, %v1151_v29 }
 0x1e8   :  { %v1225_v40 = vsub.f32 %v1224_v35, %v1307_v39 }
 0x1e9   :  { %v1089_v33 = vpop.f32.mrf.mxu2 }
 0x1ea   :  { %1227 = vst [vmem:[#allocation12 + $0x68] sm:$0xff] %v1225_v40  ;;  %v1090_v60 = vadd.f32 %v1089_v33, %v993_v36  ;;  %v1308_v44 = vadd.f32 -1.0, %v1225_v40  ;;  %v1232_v56 = vmul.f32 0.8, %v1225_v40 }
 0x1ec   :  { %v1155_v52 = vadd.f32 %v1154_v45, %v1090_v60  ;;  %vm1229_vm15 = vcmp.gt.f32.partialorder %v1308_v44, 0.0 }
 0x1ed   :  { %v1309_v16 = vsel %vm1229_vm15, 1.0, %v1479_v50 }
 0x1ee   :  { %1164 = vst [vmem:[#allocation12 + $0x70] sm:$0xff] %v1155_v52  ;;  %v1233_v57 = vadd.f32 %v1232_v56, %v1155_v52 }
 0x1f0   :  { %v1234_v6 = vsub.f32 %v1233_v57, %v1309_v16 }
 0x1f2   :  { %1236 = vst [vmem:[#allocation12 + $0x78] sm:$0xff] %v1234_v6 }
 0x1f3   :  { %1263 = dma.vmem_to_hbm [thread:$0]  %s1256_s10, 2048, %s1258_s13, [#allocation13], %s1481_s8, %s1481_s8, %s1482_s9  }
 0x1f4   :  { %1469 = dma.done.wait [#allocation7], 2048  }
 0x1f5   :  { %1470 = vsyncadd [#allocation7], 4294965248 }
 0x1f6   :  { %1471 = dma.done.wait [#allocation13], 2048  }
 0x1f7   :  { %1472 = vsyncadd [#allocation13], 4294965248 }
 0x1f8   :  { %1272 = vsyncpa [#allocation6], 1 }
 0x1f9   :  { %1273 = vsyncpa [#allocation9], 1 }
 0x1fa   :  { %1274 = vsyncpa [#allocation7], 1 }
 0x1fb   :  { %1275 = vsyncpa [#allocation13], 1 }

</bundles_post_ra>
